<compile_context>
chip_gen: v7x
topology: tpu7x:2x2x1
jax: 0.10.0
libtpu: 0.0.40
codegen_flags: <defaults>
</compile_context>

<pallas_src>
import jax
import jax.numpy as jnp
from jax import lax
from jax.experimental import pallas as pl
from jax.experimental.pallas import tpu as pltpu


def decoder_kernel(tok_ref,                      # (T,)  int32, SMEM (scalar prefetch)
                   emb_ref, h0_ref, enc_ref,     # (O,H), (1,H), (Lp,H)
                   wae_ref, wah_ref, ba_ref,     # (H,Lp), (H,Lp), (1,Lp)   Attn (split)
                   wce_ref, wca_ref, bc_ref,     # (H,H), (H,H), (1,H)      AttnCombine (split)
                   wih_ref, bih_ref,             # (H,3H), (1,3H)           GRU input gates
                   whh_ref, bhh_ref,             # (H,3H), (1,3H)           GRU hidden gates
                   wo_ref, bo_ref,               # (H,Op), (1,Op)           Out
                   logp_ref, h_out_ref, attnw_ref):
    f32 = jnp.float32
    H = h0_ref.shape[1]
    T = logp_ref.shape[0]

    # Hoist all weight loads out of the unrolled recurrence (VMEM-resident).
    wa_e = wae_ref[...]
    wa_h = wah_ref[...]
    ba = ba_ref[...]
    wc_e = wce_ref[...]
    wc_a = wca_ref[...]
    bc = bc_ref[...]
    wih = wih_ref[...]
    bih = bih_ref[...]
    whh = whh_ref[...]
    bhh = bhh_ref[...]
    wo = wo_ref[...]
    bo = bo_ref[...]
    enc = enc_ref[...]

    def step(t, h):
        tok = tok_ref[t]
        emb = emb_ref[pl.ds(tok, 1), :]                       # (1, H) embedding row

        # attn_weights = softmax(Attn(cat(embedded, hidden)))  -> (1, Lp)
        # Split matmuls instead of a lane concat (same single MXU pass at M=1).
        attn_logits = (jnp.dot(emb, wa_e, preferred_element_type=f32)
                       + jnp.dot(h, wa_h, preferred_element_type=f32) + ba)
        m = jnp.max(attn_logits, axis=1, keepdims=True)
        e = jnp.exp(attn_logits - m)                          # padded lanes -> exp(-1e30)=0
        inv = pl.reciprocal(jnp.sum(e, axis=1, keepdims=True), approx=True)
        attn_w = e * inv
        attnw_ref[pl.ds(t, 1), :] = attn_w                    # row store into resident slab

        # attn_applied = attn_w @ encoder_outputs   (1,Lp)x(Lp,H) -> (1,H)
        attn_applied = jnp.dot(attn_w, enc, preferred_element_type=f32)

        # output = relu(AttnCombine(cat(embedded, attn_applied)))  (split matmuls)
        x = jnp.maximum(
            jnp.dot(emb, wc_e, preferred_element_type=f32)
            + jnp.dot(attn_applied, wc_a, preferred_element_type=f32) + bc, 0.0)

        # Single-step GRU (PyTorch gate order r, z, n), two fused (H,3H) matmuls.
        gi = jnp.dot(x, wih, preferred_element_type=f32) + bih   # (1, 3H)
        gh = jnp.dot(h, whh, preferred_element_type=f32) + bhh   # (1, 3H)
        r = jax.nn.sigmoid(gi[:, 0:H] + gh[:, 0:H])
        z = jax.nn.sigmoid(gi[:, H:2 * H] + gh[:, H:2 * H])
        n = jnp.tanh(gi[:, 2 * H:3 * H] + r * gh[:, 2 * H:3 * H])
        h_new = (1.0 - z) * n + z * h

        # log_softmax(Out(h_new))                              -> (1, Op)
        logits = jnp.dot(h_new, wo, preferred_element_type=f32) + bo
        lm = jnp.max(logits, axis=1, keepdims=True)
        sh = logits - lm
        logp = sh - jnp.log(jnp.sum(jnp.exp(sh), axis=1, keepdims=True))
        logp_ref[pl.ds(t, 1), :] = logp                        # row store into resident slab

        return h_new

    h_final = lax.fori_loop(0, T, step, h0_ref[...], unroll=True)
    h_out_ref[...] = h_final                                   # written exactly once


def decoder_decode(tokens, hidden, encoder_outputs, p):
    """Run T DecoderRNN.forward steps (given token sequence) in ONE pallas_call.

    tokens: (T,) int32; hidden: (1,1,H) f32; encoder_outputs: (L,H) f32.
    Returns (log-probs (T,O), final hidden (1,1,H), attn weights (T,L)).
    """
    T = int(tokens.shape[0])
    O, H = p["emb"].shape
    L = int(encoder_outputs.shape[0])

    LANE = 128
    Lp = ((L + LANE - 1) // LANE) * LANE     # 20 -> 128 (lane-dense attn slab)
    Op = ((O + LANE - 1) // LANE) * LANE     # 64 -> 128 (lane-dense logp slab)
    NEG = -1e30                               # padded logits -> ~0 softmax mass

    def pad_cols(x, width, fill=0.0):
        return jnp.pad(x, ((0, 0), (0, width - x.shape[1])), constant_values=fill)

    def pad_rows(x, height):
        return jnp.pad(x, ((0, height - x.shape[0]), (0, 0)))

    enc_p = pad_rows(encoder_outputs.astype(jnp.float32), Lp)
    wa_e_p = pad_cols(p["wa_e"], Lp)
    wa_h_p = pad_cols(p["wa_h"], Lp)
    ba_p = pad_cols(p["ba"], Lp, fill=NEG)
    wo_p = pad_cols(p["wo"], Op)
    bo_p = pad_cols(p["bo"], Op, fill=NEG)

    def const_spec(shape):
        # Constant block index + full-array block => DMA'd once, VMEM-resident.
        return pl.BlockSpec(shape, lambda i, tok, _nd=len(shape): (0,) * _nd)

    grid_spec = pltpu.PrefetchScalarGridSpec(
        num_scalar_prefetch=1,                    # tokens -> SMEM
        grid=(1,),                                # single grid point; loop is in-kernel
        in_specs=[
            const_spec((O, H)),                   # embedding table
            const_spec((1, H)),                   # initial hidden
            const_spec((Lp, H)),                  # encoder outputs (row-padded)
            const_spec((H, Lp)), const_spec((H, Lp)), const_spec((1, Lp)),   # Attn
            const_spec((H, H)), const_spec((H, H)), const_spec((1, H)),      # AttnCombine
            const_spec((H, 3 * H)), const_spec((1, 3 * H)),                  # GRU W_ih/b_ih
            const_spec((H, 3 * H)), const_spec((1, 3 * H)),                  # GRU W_hh/b_hh
            const_spec((H, Op)), const_spec((1, Op)),                        # Out
        ],
        out_specs=[
            pl.BlockSpec((T, Op), lambda i, tok: (0, 0)),  # log-probs slab (resident)
            pl.BlockSpec((1, H), lambda i, tok: (0, 0)),   # final hidden
            pl.BlockSpec((T, Lp), lambda i, tok: (0, 0)),  # attn-weights slab (resident)
        ],
    )

    logp, h_fin, attn_w = pl.pallas_call(
        decoder_kernel,
        out_shape=(
            jax.ShapeDtypeStruct((T, Op), jnp.float32),
            jax.ShapeDtypeStruct((1, H), jnp.float32),
            jax.ShapeDtypeStruct((T, Lp), jnp.float32),
        ),
        grid_spec=grid_spec,
        compiler_params=pltpu.CompilerParams(
            dimension_semantics=("arbitrary",)),   # serial recurrence, single core
    )(tokens.astype(jnp.int32),
      p["emb"],
      hidden.reshape(1, H).astype(jnp.float32),
      enc_p,
      wa_e_p, wa_h_p, ba_p,
      p["wc_e"], p["wc_a"], p["bc"],
      p["wih"], p["bih"], p["whh"], p["bhh"],
      wo_p, bo_p)

    # Slice off the lane padding outside the kernel (layout plumbing only).
    return logp[:, :O], h_fin.reshape(1, 1, H), attn_w[:, :L]


def decoder_step(token, hidden, encoder_outputs, p):
    """Single step — same signature/semantics as DecoderRNN.forward."""
    return decoder_decode(token.reshape(1), hidden, encoder_outputs, p)


def make_params(key, H, O, L):
    ks = jax.random.split(key, 21)
    w = lambda k, shape, s=0.1: s * jax.random.normal(k, shape, dtype=jnp.float32)
    return dict(
        emb=w(ks[0], (O, H), 1.0),
        # Attn split into the embedded / hidden halves (no in-kernel concat).
        wa_e=w(ks[1], (H, L)), wa_h=w(ks[2], (H, L)), ba=w(ks[3], (1, L)),
        # AttnCombine split into embedded / attn_applied halves.
        wc_e=w(ks[4], (H, H)), wc_a=w(ks[5], (H, H)), bc=w(ks[6], (1, H)),
        # GRU gates fused along lanes in PyTorch order (r, z, n).
        wih=jnp.concatenate([w(ks[7], (H, H)), w(ks[8], (H, H)), w(ks[9], (H, H))], axis=1),
        whh=jnp.concatenate([w(ks[10], (H, H)), w(ks[11], (H, H)), w(ks[12], (H, H))], axis=1),
        bih=jnp.concatenate([w(ks[13], (1, H)), w(ks[14], (1, H)), w(ks[15], (1, H))], axis=1),
        bhh=jnp.concatenate([w(ks[16], (1, H)), w(ks[17], (1, H)), w(ks[18], (1, H))], axis=1),
        wo=w(ks[19], (H, O)), bo=w(ks[20], (1, O)),
    )


def reference_step(token, hidden, enc, p):
    """Pure-JAX reference for one DecoderRNN.forward (eval mode)."""
    O, H = p["emb"].shape
    emb = p["emb"][token][None, :]
    h = hidden.reshape(1, H)
    attn_w = jax.nn.softmax(emb @ p["wa_e"] + h @ p["wa_h"] + p["ba"], axis=1)
    aa = attn_w @ enc
    x = jax.nn.relu(emb @ p["wc_e"] + aa @ p["wc_a"] + p["bc"])
    gi = x @ p["wih"] + p["bih"]
    gh = h @ p["whh"] + p["bhh"]
    r = jax.nn.sigmoid(gi[:, :H] + gh[:, :H])
    z = jax.nn.sigmoid(gi[:, H:2 * H] + gh[:, H:2 * H])
    n = jnp.tanh(gi[:, 2 * H:] + r * gh[:, 2 * H:])
    h_new = (1.0 - z) * n + z * h
    logp = jax.nn.log_softmax(h_new @ p["wo"] + p["bo"], axis=1)
    return logp, h_new.reshape(1, 1, H), attn_w


if __name__ == "__main__":
    HIDDEN = 32       # hidden_size
    VOCAB = 64        # output_size
    MAXLEN = 20       # max_length
    STEPS = 6         # decode steps in one pallas_call

    key = jax.random.PRNGKey(0)
    kp, kh, ke, kt = jax.random.split(key, 4)
    params = make_params(kp, HIDDEN, VOCAB, MAXLEN)

    tokens = jax.random.randint(kt, (STEPS,), 0, VOCAB, dtype=jnp.int32)
    hidden0 = 0.1 * jax.random.normal(kh, (1, 1, HIDDEN), jnp.float32)
    encoder_outputs = jax.random.normal(ke, (MAXLEN, HIDDEN), jnp.float32)

    # Full T-step decode inside a single pallas_call (weights resident in VMEM).
    logp, h_fin, attn_w = jax.block_until_ready(
        decoder_decode(tokens, hidden0, encoder_outputs, params))

    # Step-by-step pure-JAX reference (each step == DecoderRNN.forward).
    h = hidden0
    ref_logps, ref_aws = [], []
    for i in range(STEPS):
        lp, h, aw = reference_step(tokens[i], h, encoder_outputs, params)
        ref_logps.append(lp)
        ref_aws.append(aw)
    ref_logp = jnp.concatenate(ref_logps, axis=0)
    ref_aw = jnp.concatenate(ref_aws, axis=0)

    # Tolerance 1e-3: pl.reciprocal(approx=True) has ~2^-12 relative error on
    # the attention-softmax denominator, which propagates through the step.
    TOL = 1e-3
    assert logp.shape == (STEPS, VOCAB)
    assert h_fin.shape == (1, 1, HIDDEN)
    assert attn_w.shape == (STEPS, MAXLEN)
    assert jnp.allclose(logp, ref_logp, atol=TOL, rtol=TOL)
    assert jnp.allclose(h_fin, h, atol=TOL, rtol=TOL)
    assert jnp.allclose(attn_w, ref_aw, atol=TOL, rtol=TOL)

    # Single-step API (matches the PyTorch module's forward signature).
    logp1, h1, aw1 = jax.block_until_ready(
        decoder_step(tokens[:1], hidden0, encoder_outputs, params))
    r_lp, r_h, r_aw = reference_step(tokens[0], hidden0, encoder_outputs, params)
    assert jnp.allclose(logp1, r_lp, atol=TOL, rtol=TOL)
    assert jnp.allclose(h1, r_h, atol=TOL, rtol=TOL)
    assert jnp.allclose(aw1, r_aw, atol=TOL, rtol=TOL)

    print("KERNEL_OK")
</pallas_src>

<mosaic_0001>
module attributes {stable_mosaic.version = 11 : i64} {
  func.func @decoder_kernel(%arg0: i32, %arg1: memref<6xi32, #tpu.memory_space<smem>>, %arg2: memref<64x32xf32, #tpu.memory_space<vmem>>, %arg3: memref<1x32xf32, #tpu.memory_space<vmem>>, %arg4: memref<128x32xf32, #tpu.memory_space<vmem>>, %arg5: memref<32x128xf32, #tpu.memory_space<vmem>>, %arg6: memref<32x128xf32, #tpu.memory_space<vmem>>, %arg7: memref<1x128xf32, #tpu.memory_space<vmem>>, %arg8: memref<32x32xf32, #tpu.memory_space<vmem>>, %arg9: memref<32x32xf32, #tpu.memory_space<vmem>>, %arg10: memref<1x32xf32, #tpu.memory_space<vmem>>, %arg11: memref<32x96xf32, #tpu.memory_space<vmem>>, %arg12: memref<1x96xf32, #tpu.memory_space<vmem>>, %arg13: memref<32x96xf32, #tpu.memory_space<vmem>>, %arg14: memref<1x96xf32, #tpu.memory_space<vmem>>, %arg15: memref<32x128xf32, #tpu.memory_space<vmem>>, %arg16: memref<1x128xf32, #tpu.memory_space<vmem>>, %arg17: memref<6x128xf32, #tpu.memory_space<vmem>>, %arg18: memref<1x32xf32, #tpu.memory_space<vmem>>, %arg19: memref<6x128xf32, #tpu.memory_space<vmem>>) attributes {dimension_semantics = [#tpu.dimension_semantics<arbitrary>], iteration_bounds = array<i64: 1>, scalar_prefetch = 1 : i64, scratch_operands = 0 : i64, tpu.core_type = #tpu.core_type<tc>, window_params = [{pipeline_mode = #tpu.pipeline_mode<synchronous>, transform_indices = @transform_0, window_bounds = array<i64: 64, 32>}, {pipeline_mode = #tpu.pipeline_mode<synchronous>, transform_indices = @transform_1, window_bounds = array<i64: 1, 32>}, {pipeline_mode = #tpu.pipeline_mode<synchronous>, transform_indices = @transform_2, window_bounds = array<i64: 128, 32>}, {pipeline_mode = #tpu.pipeline_mode<synchronous>, transform_indices = @transform_3, window_bounds = array<i64: 32, 128>}, {pipeline_mode = #tpu.pipeline_mode<synchronous>, transform_indices = @transform_4, window_bounds = array<i64: 32, 128>}, {pipeline_mode = #tpu.pipeline_mode<synchronous>, transform_indices = @transform_5, window_bounds = array<i64: 1, 128>}, {pipeline_mode = #tpu.pipeline_mode<synchronous>, transform_indices = @transform_6, window_bounds = array<i64: 32, 32>}, {pipeline_mode = #tpu.pipeline_mode<synchronous>, transform_indices = @transform_7, window_bounds = array<i64: 32, 32>}, {pipeline_mode = #tpu.pipeline_mode<synchronous>, transform_indices = @transform_8, window_bounds = array<i64: 1, 32>}, {pipeline_mode = #tpu.pipeline_mode<synchronous>, transform_indices = @transform_9, window_bounds = array<i64: 32, 96>}, {pipeline_mode = #tpu.pipeline_mode<synchronous>, transform_indices = @transform_10, window_bounds = array<i64: 1, 96>}, {pipeline_mode = #tpu.pipeline_mode<synchronous>, transform_indices = @transform_11, window_bounds = array<i64: 32, 96>}, {pipeline_mode = #tpu.pipeline_mode<synchronous>, transform_indices = @transform_12, window_bounds = array<i64: 1, 96>}, {pipeline_mode = #tpu.pipeline_mode<synchronous>, transform_indices = @transform_13, window_bounds = array<i64: 32, 128>}, {pipeline_mode = #tpu.pipeline_mode<synchronous>, transform_indices = @transform_14, window_bounds = array<i64: 1, 128>}, {pipeline_mode = #tpu.pipeline_mode<synchronous>, transform_indices = @transform_15, window_bounds = array<i64: 6, 128>}, {pipeline_mode = #tpu.pipeline_mode<synchronous>, transform_indices = @transform_16, window_bounds = array<i64: 1, 32>}, {pipeline_mode = #tpu.pipeline_mode<synchronous>, transform_indices = @transform_17, window_bounds = array<i64: 6, 128>}]} {
    %c0 = arith.constant 0 : index
    %c0_0 = arith.constant 0 : index
    %0 = vector.load %arg5[%c0, %c0_0] : memref<32x128xf32, #tpu.memory_space<vmem>>, vector<32x128xf32>
    %c0_1 = arith.constant 0 : index
    %c0_2 = arith.constant 0 : index
    %1 = vector.load %arg6[%c0_1, %c0_2] : memref<32x128xf32, #tpu.memory_space<vmem>>, vector<32x128xf32>
    %c0_3 = arith.constant 0 : index
    %c0_4 = arith.constant 0 : index
    %2 = vector.load %arg7[%c0_3, %c0_4] : memref<1x128xf32, #tpu.memory_space<vmem>>, vector<1x128xf32>
    %c0_5 = arith.constant 0 : index
    %c0_6 = arith.constant 0 : index
    %3 = vector.load %arg8[%c0_5, %c0_6] : memref<32x32xf32, #tpu.memory_space<vmem>>, vector<32x32xf32>
    %c0_7 = arith.constant 0 : index
    %c0_8 = arith.constant 0 : index
    %4 = vector.load %arg9[%c0_7, %c0_8] : memref<32x32xf32, #tpu.memory_space<vmem>>, vector<32x32xf32>
    %c0_9 = arith.constant 0 : index
    %c0_10 = arith.constant 0 : index
    %5 = vector.load %arg10[%c0_9, %c0_10] : memref<1x32xf32, #tpu.memory_space<vmem>>, vector<1x32xf32>
    %c0_11 = arith.constant 0 : index
    %c0_12 = arith.constant 0 : index
    %6 = vector.load %arg11[%c0_11, %c0_12] : memref<32x96xf32, #tpu.memory_space<vmem>>, vector<32x96xf32>
    %c0_13 = arith.constant 0 : index
    %c0_14 = arith.constant 0 : index
    %7 = vector.load %arg12[%c0_13, %c0_14] : memref<1x96xf32, #tpu.memory_space<vmem>>, vector<1x96xf32>
    %c0_15 = arith.constant 0 : index
    %c0_16 = arith.constant 0 : index
    %8 = vector.load %arg13[%c0_15, %c0_16] : memref<32x96xf32, #tpu.memory_space<vmem>>, vector<32x96xf32>
    %c0_17 = arith.constant 0 : index
    %c0_18 = arith.constant 0 : index
    %9 = vector.load %arg14[%c0_17, %c0_18] : memref<1x96xf32, #tpu.memory_space<vmem>>, vector<1x96xf32>
    %c0_19 = arith.constant 0 : index
    %c0_20 = arith.constant 0 : index
    %10 = vector.load %arg15[%c0_19, %c0_20] : memref<32x128xf32, #tpu.memory_space<vmem>>, vector<32x128xf32>
    %c0_21 = arith.constant 0 : index
    %c0_22 = arith.constant 0 : index
    %11 = vector.load %arg16[%c0_21, %c0_22] : memref<1x128xf32, #tpu.memory_space<vmem>>, vector<1x128xf32>
    %c0_23 = arith.constant 0 : index
    %c0_24 = arith.constant 0 : index
    %12 = vector.load %arg4[%c0_23, %c0_24] : memref<128x32xf32, #tpu.memory_space<vmem>>, vector<128x32xf32>
    %c0_25 = arith.constant 0 : index
    %c0_26 = arith.constant 0 : index
    %13 = vector.load %arg3[%c0_25, %c0_26] : memref<1x32xf32, #tpu.memory_space<vmem>>, vector<1x32xf32>
    %c0_i32 = arith.constant 0 : i32
    %14 = arith.index_cast %c0_i32 : i32 to index
    %15 = memref.load %arg1[%14] : memref<6xi32, #tpu.memory_space<smem>>
    %16 = arith.index_cast %15 : i32 to index
    %c0_27 = arith.constant 0 : index
    %17 = vector.load %arg2[%16, %c0_27] : memref<64x32xf32, #tpu.memory_space<vmem>>, vector<1x32xf32>
    %cst = arith.constant dense<0.000000e+00> : vector<1x128xf32>
    %18 = tpu.matmul %17, %0, %cst {dimension_numbers = #tpu.dot_dimension_numbers<[1], [0], [0], [1], [0, 0, 1, 1], [], []>} : vector<1x32xf32>, vector<32x128xf32>, vector<1x128xf32> -> vector<1x128xf32>
    %cst_28 = arith.constant dense<0.000000e+00> : vector<1x128xf32>
    %19 = tpu.matmul %13, %1, %cst_28 {dimension_numbers = #tpu.dot_dimension_numbers<[1], [0], [0], [1], [0, 0, 1, 1], [], []>} : vector<1x32xf32>, vector<32x128xf32>, vector<1x128xf32> -> vector<1x128xf32>
    %20 = arith.addf %18, %19 : vector<1x128xf32>
    %21 = arith.addf %20, %2 : vector<1x128xf32>
    %cst_29 = arith.constant dense<0xFF800000> : vector<1xf32>
    %22 = vector.multi_reduction <maximumf>, %21, %cst_29 [1] : vector<1x128xf32> to vector<1xf32>
    %23 = vector.shape_cast %22 : vector<1xf32> to vector<1x1xf32>
    %24 = vector.broadcast %23 : vector<1x1xf32> to vector<1x128xf32>
    %25 = arith.subf %21, %24 : vector<1x128xf32>
    %26 = math.exp %25 : vector<1x128xf32>
    %cst_30 = arith.constant dense<0.000000e+00> : vector<1xf32>
    %27 = vector.multi_reduction <add>, %26, %cst_30 [1] : vector<1x128xf32> to vector<1xf32>
    %28 = vector.shape_cast %27 : vector<1xf32> to vector<1x1xf32>
    %29 = tpu.reciprocal %28 {approx = true} : vector<1x1xf32> -> vector<1x1xf32>
    %30 = vector.broadcast %29 : vector<1x1xf32> to vector<1x128xf32>
    %31 = arith.mulf %26, %30 : vector<1x128xf32>
    %32 = arith.index_cast %c0_i32 : i32 to index
    %c0_31 = arith.constant 0 : index
    %33 = vector.load %arg19[%32, %c0_31] : memref<6x128xf32, #tpu.memory_space<vmem>>, vector<1x128xf32>
    tpu.vector_store %arg19[%32, %c0_31], %31 {strides = array<i32>} : memref<6x128xf32, #tpu.memory_space<vmem>>, vector<1x128xf32>,
    %cst_32 = arith.constant dense<0.000000e+00> : vector<1x32xf32>
    %34 = tpu.matmul %31, %12, %cst_32 {dimension_numbers = #tpu.dot_dimension_numbers<[1], [0], [0], [1], [0, 0, 1, 1], [], []>} : vector<1x128xf32>, vector<128x32xf32>, vector<1x32xf32> -> vector<1x32xf32>
    %cst_33 = arith.constant dense<0.000000e+00> : vector<1x32xf32>
    %35 = tpu.matmul %17, %3, %cst_33 {dimension_numbers = #tpu.dot_dimension_numbers<[1], [0], [0], [1], [0, 0, 1, 1], [], []>} : vector<1x32xf32>, vector<32x32xf32>, vector<1x32xf32> -> vector<1x32xf32>
    %cst_34 = arith.constant dense<0.000000e+00> : vector<1x32xf32>
    %36 = tpu.matmul %34, %4, %cst_34 {dimension_numbers = #tpu.dot_dimension_numbers<[1], [0], [0], [1], [0, 0, 1, 1], [], []>} : vector<1x32xf32>, vector<32x32xf32>, vector<1x32xf32> -> vector<1x32xf32>
    %37 = arith.addf %35, %36 : vector<1x32xf32>
    %38 = arith.addf %37, %5 : vector<1x32xf32>
    %cst_35 = arith.constant 0.000000e+00 : f32
    %39 = vector.broadcast %cst_35 : f32 to vector<1x32xf32>
    %40 = arith.maximumf %38, %39 : vector<1x32xf32>
    %cst_36 = arith.constant dense<0.000000e+00> : vector<1x96xf32>
    %41 = tpu.matmul %40, %6, %cst_36 {dimension_numbers = #tpu.dot_dimension_numbers<[1], [0], [0], [1], [0, 0, 1, 1], [], []>} : vector<1x32xf32>, vector<32x96xf32>, vector<1x96xf32> -> vector<1x96xf32>
    %42 = arith.addf %41, %7 : vector<1x96xf32>
    %cst_37 = arith.constant dense<0.000000e+00> : vector<1x96xf32>
    %43 = tpu.matmul %13, %8, %cst_37 {dimension_numbers = #tpu.dot_dimension_numbers<[1], [0], [0], [1], [0, 0, 1, 1], [], []>} : vector<1x32xf32>, vector<32x96xf32>, vector<1x96xf32> -> vector<1x96xf32>
    %44 = arith.addf %43, %9 : vector<1x96xf32>
    %45 = vector.extract_strided_slice %42 {offsets = [0, 0], sizes = [1, 32], strides = [1, 1]} : vector<1x96xf32> to vector<1x32xf32>
    %46 = vector.extract_strided_slice %44 {offsets = [0, 0], sizes = [1, 32], strides = [1, 1]} : vector<1x96xf32> to vector<1x32xf32>
    %47 = arith.addf %45, %46 : vector<1x32xf32>
    %48 = arith.negf %47 : vector<1x32xf32>
    %49 = math.exp %48 : vector<1x32xf32>
    %cst_38 = arith.constant 1.000000e+00 : f32
    %50 = vector.broadcast %cst_38 : f32 to vector<1x32xf32>
    %51 = arith.addf %50, %49 : vector<1x32xf32>
    %52 = arith.divf %50, %51 : vector<1x32xf32>
    %53 = vector.extract_strided_slice %42 {offsets = [0, 32], sizes = [1, 32], strides = [1, 1]} : vector<1x96xf32> to vector<1x32xf32>
    %54 = vector.extract_strided_slice %44 {offsets = [0, 32], sizes = [1, 32], strides = [1, 1]} : vector<1x96xf32> to vector<1x32xf32>
    %55 = arith.addf %53, %54 : vector<1x32xf32>
    %56 = arith.negf %55 : vector<1x32xf32>
    %57 = math.exp %56 : vector<1x32xf32>
    %cst_39 = arith.constant 1.000000e+00 : f32
    %58 = vector.broadcast %cst_39 : f32 to vector<1x32xf32>
    %59 = arith.addf %58, %57 : vector<1x32xf32>
    %60 = arith.divf %58, %59 : vector<1x32xf32>
    %61 = vector.extract_strided_slice %42 {offsets = [0, 64], sizes = [1, 32], strides = [1, 1]} : vector<1x96xf32> to vector<1x32xf32>
    %62 = vector.extract_strided_slice %44 {offsets = [0, 64], sizes = [1, 32], strides = [1, 1]} : vector<1x96xf32> to vector<1x32xf32>
    %63 = arith.mulf %52, %62 : vector<1x32xf32>
    %64 = arith.addf %61, %63 : vector<1x32xf32>
    %65 = math.tanh %64 : vector<1x32xf32>
    %cst_40 = arith.constant 1.000000e+00 : f32
    %66 = vector.broadcast %cst_40 : f32 to vector<1x32xf32>
    %67 = arith.subf %66, %60 : vector<1x32xf32>
    %68 = arith.mulf %67, %65 : vector<1x32xf32>
    %69 = arith.mulf %60, %13 : vector<1x32xf32>
    %70 = arith.addf %68, %69 : vector<1x32xf32>
    %cst_41 = arith.constant dense<0.000000e+00> : vector<1x128xf32>
    %71 = tpu.matmul %70, %10, %cst_41 {dimension_numbers = #tpu.dot_dimension_numbers<[1], [0], [0], [1], [0, 0, 1, 1], [], []>} : vector<1x32xf32>, vector<32x128xf32>, vector<1x128xf32> -> vector<1x128xf32>
    %72 = arith.addf %71, %11 : vector<1x128xf32>
    %cst_42 = arith.constant dense<0xFF800000> : vector<1xf32>
    %73 = vector.multi_reduction <maximumf>, %72, %cst_42 [1] : vector<1x128xf32> to vector<1xf32>
    %74 = vector.shape_cast %73 : vector<1xf32> to vector<1x1xf32>
    %75 = vector.broadcast %74 : vector<1x1xf32> to vector<1x128xf32>
    %76 = arith.subf %72, %75 : vector<1x128xf32>
    %77 = math.exp %76 : vector<1x128xf32>
    %cst_43 = arith.constant dense<0.000000e+00> : vector<1xf32>
    %78 = vector.multi_reduction <add>, %77, %cst_43 [1] : vector<1x128xf32> to vector<1xf32>
    %79 = vector.shape_cast %78 : vector<1xf32> to vector<1x1xf32>
    %80 = math.log %79 : vector<1x1xf32>
    %81 = vector.broadcast %80 : vector<1x1xf32> to vector<1x128xf32>
    %82 = arith.subf %76, %81 : vector<1x128xf32>
    %83 = arith.index_cast %c0_i32 : i32 to index
    %c0_44 = arith.constant 0 : index
    %84 = vector.load %arg17[%83, %c0_44] : memref<6x128xf32, #tpu.memory_space<vmem>>, vector<1x128xf32>
    tpu.vector_store %arg17[%83, %c0_44], %82 {strides = array<i32>} : memref<6x128xf32, #tpu.memory_space<vmem>>, vector<1x128xf32>,
    %c1_i32 = arith.constant 1 : i32
    %85 = arith.index_cast %c1_i32 : i32 to index
    %86 = memref.load %arg1[%85] : memref<6xi32, #tpu.memory_space<smem>>
    %87 = arith.index_cast %86 : i32 to index
    %c0_45 = arith.constant 0 : index
    %88 = vector.load %arg2[%87, %c0_45] : memref<64x32xf32, #tpu.memory_space<vmem>>, vector<1x32xf32>
    %cst_46 = arith.constant dense<0.000000e+00> : vector<1x128xf32>
    %89 = tpu.matmul %88, %0, %cst_46 {dimension_numbers = #tpu.dot_dimension_numbers<[1], [0], [0], [1], [0, 0, 1, 1], [], []>} : vector<1x32xf32>, vector<32x128xf32>, vector<1x128xf32> -> vector<1x128xf32>
    %cst_47 = arith.constant dense<0.000000e+00> : vector<1x128xf32>
    %90 = tpu.matmul %70, %1, %cst_47 {dimension_numbers = #tpu.dot_dimension_numbers<[1], [0], [0], [1], [0, 0, 1, 1], [], []>} : vector<1x32xf32>, vector<32x128xf32>, vector<1x128xf32> -> vector<1x128xf32>
    %91 = arith.addf %89, %90 : vector<1x128xf32>
    %92 = arith.addf %91, %2 : vector<1x128xf32>
    %cst_48 = arith.constant dense<0xFF800000> : vector<1xf32>
    %93 = vector.multi_reduction <maximumf>, %92, %cst_48 [1] : vector<1x128xf32> to vector<1xf32>
    %94 = vector.shape_cast %93 : vector<1xf32> to vector<1x1xf32>
    %95 = vector.broadcast %94 : vector<1x1xf32> to vector<1x128xf32>
    %96 = arith.subf %92, %95 : vector<1x128xf32>
    %97 = math.exp %96 : vector<1x128xf32>
    %cst_49 = arith.constant dense<0.000000e+00> : vector<1xf32>
    %98 = vector.multi_reduction <add>, %97, %cst_49 [1] : vector<1x128xf32> to vector<1xf32>
    %99 = vector.shape_cast %98 : vector<1xf32> to vector<1x1xf32>
    %100 = tpu.reciprocal %99 {approx = true} : vector<1x1xf32> -> vector<1x1xf32>
    %101 = vector.broadcast %100 : vector<1x1xf32> to vector<1x128xf32>
    %102 = arith.mulf %97, %101 : vector<1x128xf32>
    %103 = arith.index_cast %c1_i32 : i32 to index
    %c0_50 = arith.constant 0 : index
    %104 = vector.load %arg19[%103, %c0_50] : memref<6x128xf32, #tpu.memory_space<vmem>>, vector<1x128xf32>
    tpu.vector_store %arg19[%103, %c0_50], %102 {strides = array<i32>} : memref<6x128xf32, #tpu.memory_space<vmem>>, vector<1x128xf32>,
    %cst_51 = arith.constant dense<0.000000e+00> : vector<1x32xf32>
    %105 = tpu.matmul %102, %12, %cst_51 {dimension_numbers = #tpu.dot_dimension_numbers<[1], [0], [0], [1], [0, 0, 1, 1], [], []>} : vector<1x128xf32>, vector<128x32xf32>, vector<1x32xf32> -> vector<1x32xf32>
    %cst_52 = arith.constant dense<0.000000e+00> : vector<1x32xf32>
    %106 = tpu.matmul %88, %3, %cst_52 {dimension_numbers = #tpu.dot_dimension_numbers<[1], [0], [0], [1], [0, 0, 1, 1], [], []>} : vector<1x32xf32>, vector<32x32xf32>, vector<1x32xf32> -> vector<1x32xf32>
    %cst_53 = arith.constant dense<0.000000e+00> : vector<1x32xf32>
    %107 = tpu.matmul %105, %4, %cst_53 {dimension_numbers = #tpu.dot_dimension_numbers<[1], [0], [0], [1], [0, 0, 1, 1], [], []>} : vector<1x32xf32>, vector<32x32xf32>, vector<1x32xf32> -> vector<1x32xf32>
    %108 = arith.addf %106, %107 : vector<1x32xf32>
    %109 = arith.addf %108, %5 : vector<1x32xf32>
    %cst_54 = arith.constant 0.000000e+00 : f32
    %110 = vector.broadcast %cst_54 : f32 to vector<1x32xf32>
    %111 = arith.maximumf %109, %110 : vector<1x32xf32>
    %cst_55 = arith.constant dense<0.000000e+00> : vector<1x96xf32>
    %112 = tpu.matmul %111, %6, %cst_55 {dimension_numbers = #tpu.dot_dimension_numbers<[1], [0], [0], [1], [0, 0, 1, 1], [], []>} : vector<1x32xf32>, vector<32x96xf32>, vector<1x96xf32> -> vector<1x96xf32>
    %113 = arith.addf %112, %7 : vector<1x96xf32>
    %cst_56 = arith.constant dense<0.000000e+00> : vector<1x96xf32>
    %114 = tpu.matmul %70, %8, %cst_56 {dimension_numbers = #tpu.dot_dimension_numbers<[1], [0], [0], [1], [0, 0, 1, 1], [], []>} : vector<1x32xf32>, vector<32x96xf32>, vector<1x96xf32> -> vector<1x96xf32>
    %115 = arith.addf %114, %9 : vector<1x96xf32>
    %116 = vector.extract_strided_slice %113 {offsets = [0, 0], sizes = [1, 32], strides = [1, 1]} : vector<1x96xf32> to vector<1x32xf32>
    %117 = vector.extract_strided_slice %115 {offsets = [0, 0], sizes = [1, 32], strides = [1, 1]} : vector<1x96xf32> to vector<1x32xf32>
    %118 = arith.addf %116, %117 : vector<1x32xf32>
    %119 = arith.negf %118 : vector<1x32xf32>
    %120 = math.exp %119 : vector<1x32xf32>
    %cst_57 = arith.constant 1.000000e+00 : f32
    %121 = vector.broadcast %cst_57 : f32 to vector<1x32xf32>
    %122 = arith.addf %121, %120 : vector<1x32xf32>
    %123 = arith.divf %121, %122 : vector<1x32xf32>
    %124 = vector.extract_strided_slice %113 {offsets = [0, 32], sizes = [1, 32], strides = [1, 1]} : vector<1x96xf32> to vector<1x32xf32>
    %125 = vector.extract_strided_slice %115 {offsets = [0, 32], sizes = [1, 32], strides = [1, 1]} : vector<1x96xf32> to vector<1x32xf32>
    %126 = arith.addf %124, %125 : vector<1x32xf32>
    %127 = arith.negf %126 : vector<1x32xf32>
    %128 = math.exp %127 : vector<1x32xf32>
    %cst_58 = arith.constant 1.000000e+00 : f32
    %129 = vector.broadcast %cst_58 : f32 to vector<1x32xf32>
    %130 = arith.addf %129, %128 : vector<1x32xf32>
    %131 = arith.divf %129, %130 : vector<1x32xf32>
    %132 = vector.extract_strided_slice %113 {offsets = [0, 64], sizes = [1, 32], strides = [1, 1]} : vector<1x96xf32> to vector<1x32xf32>
    %133 = vector.extract_strided_slice %115 {offsets = [0, 64], sizes = [1, 32], strides = [1, 1]} : vector<1x96xf32> to vector<1x32xf32>
    %134 = arith.mulf %123, %133 : vector<1x32xf32>
    %135 = arith.addf %132, %134 : vector<1x32xf32>
    %136 = math.tanh %135 : vector<1x32xf32>
    %cst_59 = arith.constant 1.000000e+00 : f32
    %137 = vector.broadcast %cst_59 : f32 to vector<1x32xf32>
    %138 = arith.subf %137, %131 : vector<1x32xf32>
    %139 = arith.mulf %138, %136 : vector<1x32xf32>
    %140 = arith.mulf %131, %70 : vector<1x32xf32>
    %141 = arith.addf %139, %140 : vector<1x32xf32>
    %cst_60 = arith.constant dense<0.000000e+00> : vector<1x128xf32>
    %142 = tpu.matmul %141, %10, %cst_60 {dimension_numbers = #tpu.dot_dimension_numbers<[1], [0], [0], [1], [0, 0, 1, 1], [], []>} : vector<1x32xf32>, vector<32x128xf32>, vector<1x128xf32> -> vector<1x128xf32>
    %143 = arith.addf %142, %11 : vector<1x128xf32>
    %cst_61 = arith.constant dense<0xFF800000> : vector<1xf32>
    %144 = vector.multi_reduction <maximumf>, %143, %cst_61 [1] : vector<1x128xf32> to vector<1xf32>
    %145 = vector.shape_cast %144 : vector<1xf32> to vector<1x1xf32>
    %146 = vector.broadcast %145 : vector<1x1xf32> to vector<1x128xf32>
    %147 = arith.subf %143, %146 : vector<1x128xf32>
    %148 = math.exp %147 : vector<1x128xf32>
    %cst_62 = arith.constant dense<0.000000e+00> : vector<1xf32>
    %149 = vector.multi_reduction <add>, %148, %cst_62 [1] : vector<1x128xf32> to vector<1xf32>
    %150 = vector.shape_cast %149 : vector<1xf32> to vector<1x1xf32>
    %151 = math.log %150 : vector<1x1xf32>
    %152 = vector.broadcast %151 : vector<1x1xf32> to vector<1x128xf32>
    %153 = arith.subf %147, %152 : vector<1x128xf32>
    %154 = arith.index_cast %c1_i32 : i32 to index
    %c0_63 = arith.constant 0 : index
    %155 = vector.load %arg17[%154, %c0_63] : memref<6x128xf32, #tpu.memory_space<vmem>>, vector<1x128xf32>
    tpu.vector_store %arg17[%154, %c0_63], %153 {strides = array<i32>} : memref<6x128xf32, #tpu.memory_space<vmem>>, vector<1x128xf32>,
    %c2_i32 = arith.constant 2 : i32
    %156 = arith.index_cast %c2_i32 : i32 to index
    %157 = memref.load %arg1[%156] : memref<6xi32, #tpu.memory_space<smem>>
    %158 = arith.index_cast %157 : i32 to index
    %c0_64 = arith.constant 0 : index
    %159 = vector.load %arg2[%158, %c0_64] : memref<64x32xf32, #tpu.memory_space<vmem>>, vector<1x32xf32>
    %cst_65 = arith.constant dense<0.000000e+00> : vector<1x128xf32>
    %160 = tpu.matmul %159, %0, %cst_65 {dimension_numbers = #tpu.dot_dimension_numbers<[1], [0], [0], [1], [0, 0, 1, 1], [], []>} : vector<1x32xf32>, vector<32x128xf32>, vector<1x128xf32> -> vector<1x128xf32>
    %cst_66 = arith.constant dense<0.000000e+00> : vector<1x128xf32>
    %161 = tpu.matmul %141, %1, %cst_66 {dimension_numbers = #tpu.dot_dimension_numbers<[1], [0], [0], [1], [0, 0, 1, 1], [], []>} : vector<1x32xf32>, vector<32x128xf32>, vector<1x128xf32> -> vector<1x128xf32>
    %162 = arith.addf %160, %161 : vector<1x128xf32>
    %163 = arith.addf %162, %2 : vector<1x128xf32>
    %cst_67 = arith.constant dense<0xFF800000> : vector<1xf32>
    %164 = vector.multi_reduction <maximumf>, %163, %cst_67 [1] : vector<1x128xf32> to vector<1xf32>
    %165 = vector.shape_cast %164 : vector<1xf32> to vector<1x1xf32>
    %166 = vector.broadcast %165 : vector<1x1xf32> to vector<1x128xf32>
    %167 = arith.subf %163, %166 : vector<1x128xf32>
    %168 = math.exp %167 : vector<1x128xf32>
    %cst_68 = arith.constant dense<0.000000e+00> : vector<1xf32>
    %169 = vector.multi_reduction <add>, %168, %cst_68 [1] : vector<1x128xf32> to vector<1xf32>
    %170 = vector.shape_cast %169 : vector<1xf32> to vector<1x1xf32>
    %171 = tpu.reciprocal %170 {approx = true} : vector<1x1xf32> -> vector<1x1xf32>
    %172 = vector.broadcast %171 : vector<1x1xf32> to vector<1x128xf32>
    %173 = arith.mulf %168, %172 : vector<1x128xf32>
    %174 = arith.index_cast %c2_i32 : i32 to index
    %c0_69 = arith.constant 0 : index
    %175 = vector.load %arg19[%174, %c0_69] : memref<6x128xf32, #tpu.memory_space<vmem>>, vector<1x128xf32>
    tpu.vector_store %arg19[%174, %c0_69], %173 {strides = array<i32>} : memref<6x128xf32, #tpu.memory_space<vmem>>, vector<1x128xf32>,
    %cst_70 = arith.constant dense<0.000000e+00> : vector<1x32xf32>
    %176 = tpu.matmul %173, %12, %cst_70 {dimension_numbers = #tpu.dot_dimension_numbers<[1], [0], [0], [1], [0, 0, 1, 1], [], []>} : vector<1x128xf32>, vector<128x32xf32>, vector<1x32xf32> -> vector<1x32xf32>
    %cst_71 = arith.constant dense<0.000000e+00> : vector<1x32xf32>
    %177 = tpu.matmul %159, %3, %cst_71 {dimension_numbers = #tpu.dot_dimension_numbers<[1], [0], [0], [1], [0, 0, 1, 1], [], []>} : vector<1x32xf32>, vector<32x32xf32>, vector<1x32xf32> -> vector<1x32xf32>
    %cst_72 = arith.constant dense<0.000000e+00> : vector<1x32xf32>
    %178 = tpu.matmul %176, %4, %cst_72 {dimension_numbers = #tpu.dot_dimension_numbers<[1], [0], [0], [1], [0, 0, 1, 1], [], []>} : vector<1x32xf32>, vector<32x32xf32>, vector<1x32xf32> -> vector<1x32xf32>
    %179 = arith.addf %177, %178 : vector<1x32xf32>
    %180 = arith.addf %179, %5 : vector<1x32xf32>
    %cst_73 = arith.constant 0.000000e+00 : f32
    %181 = vector.broadcast %cst_73 : f32 to vector<1x32xf32>
    %182 = arith.maximumf %180, %181 : vector<1x32xf32>
    %cst_74 = arith.constant dense<0.000000e+00> : vector<1x96xf32>
    %183 = tpu.matmul %182, %6, %cst_74 {dimension_numbers = #tpu.dot_dimension_numbers<[1], [0], [0], [1], [0, 0, 1, 1], [], []>} : vector<1x32xf32>, vector<32x96xf32>, vector<1x96xf32> -> vector<1x96xf32>
    %184 = arith.addf %183, %7 : vector<1x96xf32>
    %cst_75 = arith.constant dense<0.000000e+00> : vector<1x96xf32>
    %185 = tpu.matmul %141, %8, %cst_75 {dimension_numbers = #tpu.dot_dimension_numbers<[1], [0], [0], [1], [0, 0, 1, 1], [], []>} : vector<1x32xf32>, vector<32x96xf32>, vector<1x96xf32> -> vector<1x96xf32>
    %186 = arith.addf %185, %9 : vector<1x96xf32>
    %187 = vector.extract_strided_slice %184 {offsets = [0, 0], sizes = [1, 32], strides = [1, 1]} : vector<1x96xf32> to vector<1x32xf32>
    %188 = vector.extract_strided_slice %186 {offsets = [0, 0], sizes = [1, 32], strides = [1, 1]} : vector<1x96xf32> to vector<1x32xf32>
    %189 = arith.addf %187, %188 : vector<1x32xf32>
    %190 = arith.negf %189 : vector<1x32xf32>
    %191 = math.exp %190 : vector<1x32xf32>
    %cst_76 = arith.constant 1.000000e+00 : f32
    %192 = vector.broadcast %cst_76 : f32 to vector<1x32xf32>
    %193 = arith.addf %192, %191 : vector<1x32xf32>
    %194 = arith.divf %192, %193 : vector<1x32xf32>
    %195 = vector.extract_strided_slice %184 {offsets = [0, 32], sizes = [1, 32], strides = [1, 1]} : vector<1x96xf32> to vector<1x32xf32>
    %196 = vector.extract_strided_slice %186 {offsets = [0, 32], sizes = [1, 32], strides = [1, 1]} : vector<1x96xf32> to vector<1x32xf32>
    %197 = arith.addf %195, %196 : vector<1x32xf32>
    %198 = arith.negf %197 : vector<1x32xf32>
    %199 = math.exp %198 : vector<1x32xf32>
    %cst_77 = arith.constant 1.000000e+00 : f32
    %200 = vector.broadcast %cst_77 : f32 to vector<1x32xf32>
    %201 = arith.addf %200, %199 : vector<1x32xf32>
    %202 = arith.divf %200, %201 : vector<1x32xf32>
    %203 = vector.extract_strided_slice %184 {offsets = [0, 64], sizes = [1, 32], strides = [1, 1]} : vector<1x96xf32> to vector<1x32xf32>
    %204 = vector.extract_strided_slice %186 {offsets = [0, 64], sizes = [1, 32], strides = [1, 1]} : vector<1x96xf32> to vector<1x32xf32>
    %205 = arith.mulf %194, %204 : vector<1x32xf32>
    %206 = arith.addf %203, %205 : vector<1x32xf32>
    %207 = math.tanh %206 : vector<1x32xf32>
    %cst_78 = arith.constant 1.000000e+00 : f32
    %208 = vector.broadcast %cst_78 : f32 to vector<1x32xf32>
    %209 = arith.subf %208, %202 : vector<1x32xf32>
    %210 = arith.mulf %209, %207 : vector<1x32xf32>
    %211 = arith.mulf %202, %141 : vector<1x32xf32>
    %212 = arith.addf %210, %211 : vector<1x32xf32>
    %cst_79 = arith.constant dense<0.000000e+00> : vector<1x128xf32>
    %213 = tpu.matmul %212, %10, %cst_79 {dimension_numbers = #tpu.dot_dimension_numbers<[1], [0], [0], [1], [0, 0, 1, 1], [], []>} : vector<1x32xf32>, vector<32x128xf32>, vector<1x128xf32> -> vector<1x128xf32>
    %214 = arith.addf %213, %11 : vector<1x128xf32>
    %cst_80 = arith.constant dense<0xFF800000> : vector<1xf32>
    %215 = vector.multi_reduction <maximumf>, %214, %cst_80 [1] : vector<1x128xf32> to vector<1xf32>
    %216 = vector.shape_cast %215 : vector<1xf32> to vector<1x1xf32>
    %217 = vector.broadcast %216 : vector<1x1xf32> to vector<1x128xf32>
    %218 = arith.subf %214, %217 : vector<1x128xf32>
    %219 = math.exp %218 : vector<1x128xf32>
    %cst_81 = arith.constant dense<0.000000e+00> : vector<1xf32>
    %220 = vector.multi_reduction <add>, %219, %cst_81 [1] : vector<1x128xf32> to vector<1xf32>
    %221 = vector.shape_cast %220 : vector<1xf32> to vector<1x1xf32>
    %222 = math.log %221 : vector<1x1xf32>
    %223 = vector.broadcast %222 : vector<1x1xf32> to vector<1x128xf32>
    %224 = arith.subf %218, %223 : vector<1x128xf32>
    %225 = arith.index_cast %c2_i32 : i32 to index
    %c0_82 = arith.constant 0 : index
    %226 = vector.load %arg17[%225, %c0_82] : memref<6x128xf32, #tpu.memory_space<vmem>>, vector<1x128xf32>
    tpu.vector_store %arg17[%225, %c0_82], %224 {strides = array<i32>} : memref<6x128xf32, #tpu.memory_space<vmem>>, vector<1x128xf32>,
    %c3_i32 = arith.constant 3 : i32
    %227 = arith.index_cast %c3_i32 : i32 to index
    %228 = memref.load %arg1[%227] : memref<6xi32, #tpu.memory_space<smem>>
    %229 = arith.index_cast %228 : i32 to index
    %c0_83 = arith.constant 0 : index
    %230 = vector.load %arg2[%229, %c0_83] : memref<64x32xf32, #tpu.memory_space<vmem>>, vector<1x32xf32>
    %cst_84 = arith.constant dense<0.000000e+00> : vector<1x128xf32>
    %231 = tpu.matmul %230, %0, %cst_84 {dimension_numbers = #tpu.dot_dimension_numbers<[1], [0], [0], [1], [0, 0, 1, 1], [], []>} : vector<1x32xf32>, vector<32x128xf32>, vector<1x128xf32> -> vector<1x128xf32>
    %cst_85 = arith.constant dense<0.000000e+00> : vector<1x128xf32>
    %232 = tpu.matmul %212, %1, %cst_85 {dimension_numbers = #tpu.dot_dimension_numbers<[1], [0], [0], [1], [0, 0, 1, 1], [], []>} : vector<1x32xf32>, vector<32x128xf32>, vector<1x128xf32> -> vector<1x128xf32>
    %233 = arith.addf %231, %232 : vector<1x128xf32>
    %234 = arith.addf %233, %2 : vector<1x128xf32>
    %cst_86 = arith.constant dense<0xFF800000> : vector<1xf32>
    %235 = vector.multi_reduction <maximumf>, %234, %cst_86 [1] : vector<1x128xf32> to vector<1xf32>
    %236 = vector.shape_cast %235 : vector<1xf32> to vector<1x1xf32>
    %237 = vector.broadcast %236 : vector<1x1xf32> to vector<1x128xf32>
    %238 = arith.subf %234, %237 : vector<1x128xf32>
    %239 = math.exp %238 : vector<1x128xf32>
    %cst_87 = arith.constant dense<0.000000e+00> : vector<1xf32>
    %240 = vector.multi_reduction <add>, %239, %cst_87 [1] : vector<1x128xf32> to vector<1xf32>
    %241 = vector.shape_cast %240 : vector<1xf32> to vector<1x1xf32>
    %242 = tpu.reciprocal %241 {approx = true} : vector<1x1xf32> -> vector<1x1xf32>
    %243 = vector.broadcast %242 : vector<1x1xf32> to vector<1x128xf32>
    %244 = arith.mulf %239, %243 : vector<1x128xf32>
    %245 = arith.index_cast %c3_i32 : i32 to index
    %c0_88 = arith.constant 0 : index
    %246 = vector.load %arg19[%245, %c0_88] : memref<6x128xf32, #tpu.memory_space<vmem>>, vector<1x128xf32>
    tpu.vector_store %arg19[%245, %c0_88], %244 {strides = array<i32>} : memref<6x128xf32, #tpu.memory_space<vmem>>, vector<1x128xf32>,
    %cst_89 = arith.constant dense<0.000000e+00> : vector<1x32xf32>
    %247 = tpu.matmul %244, %12, %cst_89 {dimension_numbers = #tpu.dot_dimension_numbers<[1], [0], [0], [1], [0, 0, 1, 1], [], []>} : vector<1x128xf32>, vector<128x32xf32>, vector<1x32xf32> -> vector<1x32xf32>
    %cst_90 = arith.constant dense<0.000000e+00> : vector<1x32xf32>
    %248 = tpu.matmul %230, %3, %cst_90 {dimension_numbers = #tpu.dot_dimension_numbers<[1], [0], [0], [1], [0, 0, 1, 1], [], []>} : vector<1x32xf32>, vector<32x32xf32>, vector<1x32xf32> -> vector<1x32xf32>
    %cst_91 = arith.constant dense<0.000000e+00> : vector<1x32xf32>
    %249 = tpu.matmul %247, %4, %cst_91 {dimension_numbers = #tpu.dot_dimension_numbers<[1], [0], [0], [1], [0, 0, 1, 1], [], []>} : vector<1x32xf32>, vector<32x32xf32>, vector<1x32xf32> -> vector<1x32xf32>
    %250 = arith.addf %248, %249 : vector<1x32xf32>
    %251 = arith.addf %250, %5 : vector<1x32xf32>
    %cst_92 = arith.constant 0.000000e+00 : f32
    %252 = vector.broadcast %cst_92 : f32 to vector<1x32xf32>
    %253 = arith.maximumf %251, %252 : vector<1x32xf32>
    %cst_93 = arith.constant dense<0.000000e+00> : vector<1x96xf32>
    %254 = tpu.matmul %253, %6, %cst_93 {dimension_numbers = #tpu.dot_dimension_numbers<[1], [0], [0], [1], [0, 0, 1, 1], [], []>} : vector<1x32xf32>, vector<32x96xf32>, vector<1x96xf32> -> vector<1x96xf32>
    %255 = arith.addf %254, %7 : vector<1x96xf32>
    %cst_94 = arith.constant dense<0.000000e+00> : vector<1x96xf32>
    %256 = tpu.matmul %212, %8, %cst_94 {dimension_numbers = #tpu.dot_dimension_numbers<[1], [0], [0], [1], [0, 0, 1, 1], [], []>} : vector<1x32xf32>, vector<32x96xf32>, vector<1x96xf32> -> vector<1x96xf32>
    %257 = arith.addf %256, %9 : vector<1x96xf32>
    %258 = vector.extract_strided_slice %255 {offsets = [0, 0], sizes = [1, 32], strides = [1, 1]} : vector<1x96xf32> to vector<1x32xf32>
    %259 = vector.extract_strided_slice %257 {offsets = [0, 0], sizes = [1, 32], strides = [1, 1]} : vector<1x96xf32> to vector<1x32xf32>
    %260 = arith.addf %258, %259 : vector<1x32xf32>
    %261 = arith.negf %260 : vector<1x32xf32>
    %262 = math.exp %261 : vector<1x32xf32>
    %cst_95 = arith.constant 1.000000e+00 : f32
    %263 = vector.broadcast %cst_95 : f32 to vector<1x32xf32>
    %264 = arith.addf %263, %262 : vector<1x32xf32>
    %265 = arith.divf %263, %264 : vector<1x32xf32>
    %266 = vector.extract_strided_slice %255 {offsets = [0, 32], sizes = [1, 32], strides = [1, 1]} : vector<1x96xf32> to vector<1x32xf32>
    %267 = vector.extract_strided_slice %257 {offsets = [0, 32], sizes = [1, 32], strides = [1, 1]} : vector<1x96xf32> to vector<1x32xf32>
    %268 = arith.addf %266, %267 : vector<1x32xf32>
    %269 = arith.negf %268 : vector<1x32xf32>
    %270 = math.exp %269 : vector<1x32xf32>
    %cst_96 = arith.constant 1.000000e+00 : f32
    %271 = vector.broadcast %cst_96 : f32 to vector<1x32xf32>
    %272 = arith.addf %271, %270 : vector<1x32xf32>
    %273 = arith.divf %271, %272 : vector<1x32xf32>
    %274 = vector.extract_strided_slice %255 {offsets = [0, 64], sizes = [1, 32], strides = [1, 1]} : vector<1x96xf32> to vector<1x32xf32>
    %275 = vector.extract_strided_slice %257 {offsets = [0, 64], sizes = [1, 32], strides = [1, 1]} : vector<1x96xf32> to vector<1x32xf32>
    %276 = arith.mulf %265, %275 : vector<1x32xf32>
    %277 = arith.addf %274, %276 : vector<1x32xf32>
    %278 = math.tanh %277 : vector<1x32xf32>
    %cst_97 = arith.constant 1.000000e+00 : f32
    %279 = vector.broadcast %cst_97 : f32 to vector<1x32xf32>
    %280 = arith.subf %279, %273 : vector<1x32xf32>
    %281 = arith.mulf %280, %278 : vector<1x32xf32>
    %282 = arith.mulf %273, %212 : vector<1x32xf32>
    %283 = arith.addf %281, %282 : vector<1x32xf32>
    %cst_98 = arith.constant dense<0.000000e+00> : vector<1x128xf32>
    %284 = tpu.matmul %283, %10, %cst_98 {dimension_numbers = #tpu.dot_dimension_numbers<[1], [0], [0], [1], [0, 0, 1, 1], [], []>} : vector<1x32xf32>, vector<32x128xf32>, vector<1x128xf32> -> vector<1x128xf32>
    %285 = arith.addf %284, %11 : vector<1x128xf32>
    %cst_99 = arith.constant dense<0xFF800000> : vector<1xf32>
    %286 = vector.multi_reduction <maximumf>, %285, %cst_99 [1] : vector<1x128xf32> to vector<1xf32>
    %287 = vector.shape_cast %286 : vector<1xf32> to vector<1x1xf32>
    %288 = vector.broadcast %287 : vector<1x1xf32> to vector<1x128xf32>
    %289 = arith.subf %285, %288 : vector<1x128xf32>
    %290 = math.exp %289 : vector<1x128xf32>
    %cst_100 = arith.constant dense<0.000000e+00> : vector<1xf32>
    %291 = vector.multi_reduction <add>, %290, %cst_100 [1] : vector<1x128xf32> to vector<1xf32>
    %292 = vector.shape_cast %291 : vector<1xf32> to vector<1x1xf32>
    %293 = math.log %292 : vector<1x1xf32>
    %294 = vector.broadcast %293 : vector<1x1xf32> to vector<1x128xf32>
    %295 = arith.subf %289, %294 : vector<1x128xf32>
    %296 = arith.index_cast %c3_i32 : i32 to index
    %c0_101 = arith.constant 0 : index
    %297 = vector.load %arg17[%296, %c0_101] : memref<6x128xf32, #tpu.memory_space<vmem>>, vector<1x128xf32>
    tpu.vector_store %arg17[%296, %c0_101], %295 {strides = array<i32>} : memref<6x128xf32, #tpu.memory_space<vmem>>, vector<1x128xf32>,
    %c4_i32 = arith.constant 4 : i32
    %298 = arith.index_cast %c4_i32 : i32 to index
    %299 = memref.load %arg1[%298] : memref<6xi32, #tpu.memory_space<smem>>
    %300 = arith.index_cast %299 : i32 to index
    %c0_102 = arith.constant 0 : index
    %301 = vector.load %arg2[%300, %c0_102] : memref<64x32xf32, #tpu.memory_space<vmem>>, vector<1x32xf32>
    %cst_103 = arith.constant dense<0.000000e+00> : vector<1x128xf32>
    %302 = tpu.matmul %301, %0, %cst_103 {dimension_numbers = #tpu.dot_dimension_numbers<[1], [0], [0], [1], [0, 0, 1, 1], [], []>} : vector<1x32xf32>, vector<32x128xf32>, vector<1x128xf32> -> vector<1x128xf32>
    %cst_104 = arith.constant dense<0.000000e+00> : vector<1x128xf32>
    %303 = tpu.matmul %283, %1, %cst_104 {dimension_numbers = #tpu.dot_dimension_numbers<[1], [0], [0], [1], [0, 0, 1, 1], [], []>} : vector<1x32xf32>, vector<32x128xf32>, vector<1x128xf32> -> vector<1x128xf32>
    %304 = arith.addf %302, %303 : vector<1x128xf32>
    %305 = arith.addf %304, %2 : vector<1x128xf32>
    %cst_105 = arith.constant dense<0xFF800000> : vector<1xf32>
    %306 = vector.multi_reduction <maximumf>, %305, %cst_105 [1] : vector<1x128xf32> to vector<1xf32>
    %307 = vector.shape_cast %306 : vector<1xf32> to vector<1x1xf32>
    %308 = vector.broadcast %307 : vector<1x1xf32> to vector<1x128xf32>
    %309 = arith.subf %305, %308 : vector<1x128xf32>
    %310 = math.exp %309 : vector<1x128xf32>
    %cst_106 = arith.constant dense<0.000000e+00> : vector<1xf32>
    %311 = vector.multi_reduction <add>, %310, %cst_106 [1] : vector<1x128xf32> to vector<1xf32>
    %312 = vector.shape_cast %311 : vector<1xf32> to vector<1x1xf32>
    %313 = tpu.reciprocal %312 {approx = true} : vector<1x1xf32> -> vector<1x1xf32>
    %314 = vector.broadcast %313 : vector<1x1xf32> to vector<1x128xf32>
    %315 = arith.mulf %310, %314 : vector<1x128xf32>
    %316 = arith.index_cast %c4_i32 : i32 to index
    %c0_107 = arith.constant 0 : index
    %317 = vector.load %arg19[%316, %c0_107] : memref<6x128xf32, #tpu.memory_space<vmem>>, vector<1x128xf32>
    tpu.vector_store %arg19[%316, %c0_107], %315 {strides = array<i32>} : memref<6x128xf32, #tpu.memory_space<vmem>>, vector<1x128xf32>,
    %cst_108 = arith.constant dense<0.000000e+00> : vector<1x32xf32>
    %318 = tpu.matmul %315, %12, %cst_108 {dimension_numbers = #tpu.dot_dimension_numbers<[1], [0], [0], [1], [0, 0, 1, 1], [], []>} : vector<1x128xf32>, vector<128x32xf32>, vector<1x32xf32> -> vector<1x32xf32>
    %cst_109 = arith.constant dense<0.000000e+00> : vector<1x32xf32>
    %319 = tpu.matmul %301, %3, %cst_109 {dimension_numbers = #tpu.dot_dimension_numbers<[1], [0], [0], [1], [0, 0, 1, 1], [], []>} : vector<1x32xf32>, vector<32x32xf32>, vector<1x32xf32> -> vector<1x32xf32>
    %cst_110 = arith.constant dense<0.000000e+00> : vector<1x32xf32>
    %320 = tpu.matmul %318, %4, %cst_110 {dimension_numbers = #tpu.dot_dimension_numbers<[1], [0], [0], [1], [0, 0, 1, 1], [], []>} : vector<1x32xf32>, vector<32x32xf32>, vector<1x32xf32> -> vector<1x32xf32>
    %321 = arith.addf %319, %320 : vector<1x32xf32>
    %322 = arith.addf %321, %5 : vector<1x32xf32>
    %cst_111 = arith.constant 0.000000e+00 : f32
    %323 = vector.broadcast %cst_111 : f32 to vector<1x32xf32>
    %324 = arith.maximumf %322, %323 : vector<1x32xf32>
    %cst_112 = arith.constant dense<0.000000e+00> : vector<1x96xf32>
    %325 = tpu.matmul %324, %6, %cst_112 {dimension_numbers = #tpu.dot_dimension_numbers<[1], [0], [0], [1], [0, 0, 1, 1], [], []>} : vector<1x32xf32>, vector<32x96xf32>, vector<1x96xf32> -> vector<1x96xf32>
    %326 = arith.addf %325, %7 : vector<1x96xf32>
    %cst_113 = arith.constant dense<0.000000e+00> : vector<1x96xf32>
    %327 = tpu.matmul %283, %8, %cst_113 {dimension_numbers = #tpu.dot_dimension_numbers<[1], [0], [0], [1], [0, 0, 1, 1], [], []>} : vector<1x32xf32>, vector<32x96xf32>, vector<1x96xf32> -> vector<1x96xf32>
    %328 = arith.addf %327, %9 : vector<1x96xf32>
    %329 = vector.extract_strided_slice %326 {offsets = [0, 0], sizes = [1, 32], strides = [1, 1]} : vector<1x96xf32> to vector<1x32xf32>
    %330 = vector.extract_strided_slice %328 {offsets = [0, 0], sizes = [1, 32], strides = [1, 1]} : vector<1x96xf32> to vector<1x32xf32>
    %331 = arith.addf %329, %330 : vector<1x32xf32>
    %332 = arith.negf %331 : vector<1x32xf32>
    %333 = math.exp %332 : vector<1x32xf32>
    %cst_114 = arith.constant 1.000000e+00 : f32
    %334 = vector.broadcast %cst_114 : f32 to vector<1x32xf32>
    %335 = arith.addf %334, %333 : vector<1x32xf32>
    %336 = arith.divf %334, %335 : vector<1x32xf32>
    %337 = vector.extract_strided_slice %326 {offsets = [0, 32], sizes = [1, 32], strides = [1, 1]} : vector<1x96xf32> to vector<1x32xf32>
    %338 = vector.extract_strided_slice %328 {offsets = [0, 32], sizes = [1, 32], strides = [1, 1]} : vector<1x96xf32> to vector<1x32xf32>
    %339 = arith.addf %337, %338 : vector<1x32xf32>
    %340 = arith.negf %339 : vector<1x32xf32>
    %341 = math.exp %340 : vector<1x32xf32>
    %cst_115 = arith.constant 1.000000e+00 : f32
    %342 = vector.broadcast %cst_115 : f32 to vector<1x32xf32>
    %343 = arith.addf %342, %341 : vector<1x32xf32>
    %344 = arith.divf %342, %343 : vector<1x32xf32>
    %345 = vector.extract_strided_slice %326 {offsets = [0, 64], sizes = [1, 32], strides = [1, 1]} : vector<1x96xf32> to vector<1x32xf32>
    %346 = vector.extract_strided_slice %328 {offsets = [0, 64], sizes = [1, 32], strides = [1, 1]} : vector<1x96xf32> to vector<1x32xf32>
    %347 = arith.mulf %336, %346 : vector<1x32xf32>
    %348 = arith.addf %345, %347 : vector<1x32xf32>
    %349 = math.tanh %348 : vector<1x32xf32>
    %cst_116 = arith.constant 1.000000e+00 : f32
    %350 = vector.broadcast %cst_116 : f32 to vector<1x32xf32>
    %351 = arith.subf %350, %344 : vector<1x32xf32>
    %352 = arith.mulf %351, %349 : vector<1x32xf32>
    %353 = arith.mulf %344, %283 : vector<1x32xf32>
    %354 = arith.addf %352, %353 : vector<1x32xf32>
    %cst_117 = arith.constant dense<0.000000e+00> : vector<1x128xf32>
    %355 = tpu.matmul %354, %10, %cst_117 {dimension_numbers = #tpu.dot_dimension_numbers<[1], [0], [0], [1], [0, 0, 1, 1], [], []>} : vector<1x32xf32>, vector<32x128xf32>, vector<1x128xf32> -> vector<1x128xf32>
    %356 = arith.addf %355, %11 : vector<1x128xf32>
    %cst_118 = arith.constant dense<0xFF800000> : vector<1xf32>
    %357 = vector.multi_reduction <maximumf>, %356, %cst_118 [1] : vector<1x128xf32> to vector<1xf32>
    %358 = vector.shape_cast %357 : vector<1xf32> to vector<1x1xf32>
    %359 = vector.broadcast %358 : vector<1x1xf32> to vector<1x128xf32>
    %360 = arith.subf %356, %359 : vector<1x128xf32>
    %361 = math.exp %360 : vector<1x128xf32>
    %cst_119 = arith.constant dense<0.000000e+00> : vector<1xf32>
    %362 = vector.multi_reduction <add>, %361, %cst_119 [1] : vector<1x128xf32> to vector<1xf32>
    %363 = vector.shape_cast %362 : vector<1xf32> to vector<1x1xf32>
    %364 = math.log %363 : vector<1x1xf32>
    %365 = vector.broadcast %364 : vector<1x1xf32> to vector<1x128xf32>
    %366 = arith.subf %360, %365 : vector<1x128xf32>
    %367 = arith.index_cast %c4_i32 : i32 to index
    %c0_120 = arith.constant 0 : index
    %368 = vector.load %arg17[%367, %c0_120] : memref<6x128xf32, #tpu.memory_space<vmem>>, vector<1x128xf32>
    tpu.vector_store %arg17[%367, %c0_120], %366 {strides = array<i32>} : memref<6x128xf32, #tpu.memory_space<vmem>>, vector<1x128xf32>,
    %c5_i32 = arith.constant 5 : i32
    %369 = arith.index_cast %c5_i32 : i32 to index
    %370 = memref.load %arg1[%369] : memref<6xi32, #tpu.memory_space<smem>>
    %371 = arith.index_cast %370 : i32 to index
    %c0_121 = arith.constant 0 : index
    %372 = vector.load %arg2[%371, %c0_121] : memref<64x32xf32, #tpu.memory_space<vmem>>, vector<1x32xf32>
    %cst_122 = arith.constant dense<0.000000e+00> : vector<1x128xf32>
    %373 = tpu.matmul %372, %0, %cst_122 {dimension_numbers = #tpu.dot_dimension_numbers<[1], [0], [0], [1], [0, 0, 1, 1], [], []>} : vector<1x32xf32>, vector<32x128xf32>, vector<1x128xf32> -> vector<1x128xf32>
    %cst_123 = arith.constant dense<0.000000e+00> : vector<1x128xf32>
    %374 = tpu.matmul %354, %1, %cst_123 {dimension_numbers = #tpu.dot_dimension_numbers<[1], [0], [0], [1], [0, 0, 1, 1], [], []>} : vector<1x32xf32>, vector<32x128xf32>, vector<1x128xf32> -> vector<1x128xf32>
    %375 = arith.addf %373, %374 : vector<1x128xf32>
    %376 = arith.addf %375, %2 : vector<1x128xf32>
    %cst_124 = arith.constant dense<0xFF800000> : vector<1xf32>
    %377 = vector.multi_reduction <maximumf>, %376, %cst_124 [1] : vector<1x128xf32> to vector<1xf32>
    %378 = vector.shape_cast %377 : vector<1xf32> to vector<1x1xf32>
    %379 = vector.broadcast %378 : vector<1x1xf32> to vector<1x128xf32>
    %380 = arith.subf %376, %379 : vector<1x128xf32>
    %381 = math.exp %380 : vector<1x128xf32>
    %cst_125 = arith.constant dense<0.000000e+00> : vector<1xf32>
    %382 = vector.multi_reduction <add>, %381, %cst_125 [1] : vector<1x128xf32> to vector<1xf32>
    %383 = vector.shape_cast %382 : vector<1xf32> to vector<1x1xf32>
    %384 = tpu.reciprocal %383 {approx = true} : vector<1x1xf32> -> vector<1x1xf32>
    %385 = vector.broadcast %384 : vector<1x1xf32> to vector<1x128xf32>
    %386 = arith.mulf %381, %385 : vector<1x128xf32>
    %387 = arith.index_cast %c5_i32 : i32 to index
    %c0_126 = arith.constant 0 : index
    %388 = vector.load %arg19[%387, %c0_126] : memref<6x128xf32, #tpu.memory_space<vmem>>, vector<1x128xf32>
    tpu.vector_store %arg19[%387, %c0_126], %386 {strides = array<i32>} : memref<6x128xf32, #tpu.memory_space<vmem>>, vector<1x128xf32>,
    %cst_127 = arith.constant dense<0.000000e+00> : vector<1x32xf32>
    %389 = tpu.matmul %386, %12, %cst_127 {dimension_numbers = #tpu.dot_dimension_numbers<[1], [0], [0], [1], [0, 0, 1, 1], [], []>} : vector<1x128xf32>, vector<128x32xf32>, vector<1x32xf32> -> vector<1x32xf32>
    %cst_128 = arith.constant dense<0.000000e+00> : vector<1x32xf32>
    %390 = tpu.matmul %372, %3, %cst_128 {dimension_numbers = #tpu.dot_dimension_numbers<[1], [0], [0], [1], [0, 0, 1, 1], [], []>} : vector<1x32xf32>, vector<32x32xf32>, vector<1x32xf32> -> vector<1x32xf32>
    %cst_129 = arith.constant dense<0.000000e+00> : vector<1x32xf32>
    %391 = tpu.matmul %389, %4, %cst_129 {dimension_numbers = #tpu.dot_dimension_numbers<[1], [0], [0], [1], [0, 0, 1, 1], [], []>} : vector<1x32xf32>, vector<32x32xf32>, vector<1x32xf32> -> vector<1x32xf32>
    %392 = arith.addf %390, %391 : vector<1x32xf32>
    %393 = arith.addf %392, %5 : vector<1x32xf32>
    %cst_130 = arith.constant 0.000000e+00 : f32
    %394 = vector.broadcast %cst_130 : f32 to vector<1x32xf32>
    %395 = arith.maximumf %393, %394 : vector<1x32xf32>
    %cst_131 = arith.constant dense<0.000000e+00> : vector<1x96xf32>
    %396 = tpu.matmul %395, %6, %cst_131 {dimension_numbers = #tpu.dot_dimension_numbers<[1], [0], [0], [1], [0, 0, 1, 1], [], []>} : vector<1x32xf32>, vector<32x96xf32>, vector<1x96xf32> -> vector<1x96xf32>
    %397 = arith.addf %396, %7 : vector<1x96xf32>
    %cst_132 = arith.constant dense<0.000000e+00> : vector<1x96xf32>
    %398 = tpu.matmul %354, %8, %cst_132 {dimension_numbers = #tpu.dot_dimension_numbers<[1], [0], [0], [1], [0, 0, 1, 1], [], []>} : vector<1x32xf32>, vector<32x96xf32>, vector<1x96xf32> -> vector<1x96xf32>
    %399 = arith.addf %398, %9 : vector<1x96xf32>
    %400 = vector.extract_strided_slice %397 {offsets = [0, 0], sizes = [1, 32], strides = [1, 1]} : vector<1x96xf32> to vector<1x32xf32>
    %401 = vector.extract_strided_slice %399 {offsets = [0, 0], sizes = [1, 32], strides = [1, 1]} : vector<1x96xf32> to vector<1x32xf32>
    %402 = arith.addf %400, %401 : vector<1x32xf32>
    %403 = arith.negf %402 : vector<1x32xf32>
    %404 = math.exp %403 : vector<1x32xf32>
    %cst_133 = arith.constant 1.000000e+00 : f32
    %405 = vector.broadcast %cst_133 : f32 to vector<1x32xf32>
    %406 = arith.addf %405, %404 : vector<1x32xf32>
    %407 = arith.divf %405, %406 : vector<1x32xf32>
    %408 = vector.extract_strided_slice %397 {offsets = [0, 32], sizes = [1, 32], strides = [1, 1]} : vector<1x96xf32> to vector<1x32xf32>
    %409 = vector.extract_strided_slice %399 {offsets = [0, 32], sizes = [1, 32], strides = [1, 1]} : vector<1x96xf32> to vector<1x32xf32>
    %410 = arith.addf %408, %409 : vector<1x32xf32>
    %411 = arith.negf %410 : vector<1x32xf32>
    %412 = math.exp %411 : vector<1x32xf32>
    %cst_134 = arith.constant 1.000000e+00 : f32
    %413 = vector.broadcast %cst_134 : f32 to vector<1x32xf32>
    %414 = arith.addf %413, %412 : vector<1x32xf32>
    %415 = arith.divf %413, %414 : vector<1x32xf32>
    %416 = vector.extract_strided_slice %397 {offsets = [0, 64], sizes = [1, 32], strides = [1, 1]} : vector<1x96xf32> to vector<1x32xf32>
    %417 = vector.extract_strided_slice %399 {offsets = [0, 64], sizes = [1, 32], strides = [1, 1]} : vector<1x96xf32> to vector<1x32xf32>
    %418 = arith.mulf %407, %417 : vector<1x32xf32>
    %419 = arith.addf %416, %418 : vector<1x32xf32>
    %420 = math.tanh %419 : vector<1x32xf32>
    %cst_135 = arith.constant 1.000000e+00 : f32
    %421 = vector.broadcast %cst_135 : f32 to vector<1x32xf32>
    %422 = arith.subf %421, %415 : vector<1x32xf32>
    %423 = arith.mulf %422, %420 : vector<1x32xf32>
    %424 = arith.mulf %415, %354 : vector<1x32xf32>
    %425 = arith.addf %423, %424 : vector<1x32xf32>
    %cst_136 = arith.constant dense<0.000000e+00> : vector<1x128xf32>
    %426 = tpu.matmul %425, %10, %cst_136 {dimension_numbers = #tpu.dot_dimension_numbers<[1], [0], [0], [1], [0, 0, 1, 1], [], []>} : vector<1x32xf32>, vector<32x128xf32>, vector<1x128xf32> -> vector<1x128xf32>
    %427 = arith.addf %426, %11 : vector<1x128xf32>
    %cst_137 = arith.constant dense<0xFF800000> : vector<1xf32>
    %428 = vector.multi_reduction <maximumf>, %427, %cst_137 [1] : vector<1x128xf32> to vector<1xf32>
    %429 = vector.shape_cast %428 : vector<1xf32> to vector<1x1xf32>
    %430 = vector.broadcast %429 : vector<1x1xf32> to vector<1x128xf32>
    %431 = arith.subf %427, %430 : vector<1x128xf32>
    %432 = math.exp %431 : vector<1x128xf32>
    %cst_138 = arith.constant dense<0.000000e+00> : vector<1xf32>
    %433 = vector.multi_reduction <add>, %432, %cst_138 [1] : vector<1x128xf32> to vector<1xf32>
    %434 = vector.shape_cast %433 : vector<1xf32> to vector<1x1xf32>
    %435 = math.log %434 : vector<1x1xf32>
    %436 = vector.broadcast %435 : vector<1x1xf32> to vector<1x128xf32>
    %437 = arith.subf %431, %436 : vector<1x128xf32>
    %438 = arith.index_cast %c5_i32 : i32 to index
    %c0_139 = arith.constant 0 : index
    %439 = vector.load %arg17[%438, %c0_139] : memref<6x128xf32, #tpu.memory_space<vmem>>, vector<1x128xf32>
    tpu.vector_store %arg17[%438, %c0_139], %437 {strides = array<i32>} : memref<6x128xf32, #tpu.memory_space<vmem>>, vector<1x128xf32>,
    %c6_i32 = arith.constant 6 : i32
    %c0_140 = arith.constant 0 : index
    %c0_141 = arith.constant 0 : index
    %440 = vector.load %arg18[%c0_140, %c0_141] : memref<1x32xf32, #tpu.memory_space<vmem>>, vector<1x32xf32>
    tpu.vector_store %arg18[%c0_140, %c0_141], %425 {strides = array<i32>} : memref<1x32xf32, #tpu.memory_space<vmem>>, vector<1x32xf32>,
    return
  }
  func.func @transform_0(%arg0: i32, %arg1: memref<6xi32, #tpu.memory_space<smem>>) -> (i32, i32) {
    %c0_i32 = arith.constant 0 : i32
    %c0_i32_0 = arith.constant 0 : i32
    %c0_i32_1 = arith.constant 0 : i32
    return %c0_i32, %c0_i32_0 : i32, i32
  }
  func.func @transform_1(%arg0: i32, %arg1: memref<6xi32, #tpu.memory_space<smem>>) -> (i32, i32) {
    %c0_i32 = arith.constant 0 : i32
    %c0_i32_0 = arith.constant 0 : i32
    %c0_i32_1 = arith.constant 0 : i32
    return %c0_i32, %c0_i32_0 : i32, i32
  }
  func.func @transform_2(%arg0: i32, %arg1: memref<6xi32, #tpu.memory_space<smem>>) -> (i32, i32) {
    %c0_i32 = arith.constant 0 : i32
    %c0_i32_0 = arith.constant 0 : i32
    %c0_i32_1 = arith.constant 0 : i32
    return %c0_i32, %c0_i32_0 : i32, i32
  }
  func.func @transform_3(%arg0: i32, %arg1: memref<6xi32, #tpu.memory_space<smem>>) -> (i32, i32) {
    %c0_i32 = arith.constant 0 : i32
    %c0_i32_0 = arith.constant 0 : i32
    %c0_i32_1 = arith.constant 0 : i32
    return %c0_i32, %c0_i32_0 : i32, i32
  }
  func.func @transform_4(%arg0: i32, %arg1: memref<6xi32, #tpu.memory_space<smem>>) -> (i32, i32) {
    %c0_i32 = arith.constant 0 : i32
    %c0_i32_0 = arith.constant 0 : i32
    %c0_i32_1 = arith.constant 0 : i32
    return %c0_i32, %c0_i32_0 : i32, i32
  }
  func.func @transform_5(%arg0: i32, %arg1: memref<6xi32, #tpu.memory_space<smem>>) -> (i32, i32) {
    %c0_i32 = arith.constant 0 : i32
    %c0_i32_0 = arith.constant 0 : i32
    %c0_i32_1 = arith.constant 0 : i32
    return %c0_i32, %c0_i32_0 : i32, i32
  }
  func.func @transform_6(%arg0: i32, %arg1: memref<6xi32, #tpu.memory_space<smem>>) -> (i32, i32) {
    %c0_i32 = arith.constant 0 : i32
    %c0_i32_0 = arith.constant 0 : i32
    %c0_i32_1 = arith.constant 0 : i32
    return %c0_i32, %c0_i32_0 : i32, i32
  }
  func.func @transform_7(%arg0: i32, %arg1: memref<6xi32, #tpu.memory_space<smem>>) -> (i32, i32) {
    %c0_i32 = arith.constant 0 : i32
    %c0_i32_0 = arith.constant 0 : i32
    %c0_i32_1 = arith.constant 0 : i32
    return %c0_i32, %c0_i32_0 : i32, i32
  }
  func.func @transform_8(%arg0: i32, %arg1: memref<6xi32, #tpu.memory_space<smem>>) -> (i32, i32) {
    %c0_i32 = arith.constant 0 : i32
    %c0_i32_0 = arith.constant 0 : i32
    %c0_i32_1 = arith.constant 0 : i32
    return %c0_i32, %c0_i32_0 : i32, i32
  }
  func.func @transform_9(%arg0: i32, %arg1: memref<6xi32, #tpu.memory_space<smem>>) -> (i32, i32) {
    %c0_i32 = arith.constant 0 : i32
    %c0_i32_0 = arith.constant 0 : i32
    %c0_i32_1 = arith.constant 0 : i32
    return %c0_i32, %c0_i32_0 : i32, i32
  }
  func.func @transform_10(%arg0: i32, %arg1: memref<6xi32, #tpu.memory_space<smem>>) -> (i32, i32) {
    %c0_i32 = arith.constant 0 : i32
    %c0_i32_0 = arith.constant 0 : i32
    %c0_i32_1 = arith.constant 0 : i32
    return %c0_i32, %c0_i32_0 : i32, i32
  }
  func.func @transform_11(%arg0: i32, %arg1: memref<6xi32, #tpu.memory_space<smem>>) -> (i32, i32) {
    %c0_i32 = arith.constant 0 : i32
    %c0_i32_0 = arith.constant 0 : i32
    %c0_i32_1 = arith.constant 0 : i32
    return %c0_i32, %c0_i32_0 : i32, i32
  }
  func.func @transform_12(%arg0: i32, %arg1: memref<6xi32, #tpu.memory_space<smem>>) -> (i32, i32) {
    %c0_i32 = arith.constant 0 : i32
    %c0_i32_0 = arith.constant 0 : i32
    %c0_i32_1 = arith.constant 0 : i32
    return %c0_i32, %c0_i32_0 : i32, i32
  }
  func.func @transform_13(%arg0: i32, %arg1: memref<6xi32, #tpu.memory_space<smem>>) -> (i32, i32) {
    %c0_i32 = arith.constant 0 : i32
    %c0_i32_0 = arith.constant 0 : i32
    %c0_i32_1 = arith.constant 0 : i32
    return %c0_i32, %c0_i32_0 : i32, i32
  }
  func.func @transform_14(%arg0: i32, %arg1: memref<6xi32, #tpu.memory_space<smem>>) -> (i32, i32) {
    %c0_i32 = arith.constant 0 : i32
    %c0_i32_0 = arith.constant 0 : i32
    %c0_i32_1 = arith.constant 0 : i32
    return %c0_i32, %c0_i32_0 : i32, i32
  }
  func.func @transform_15(%arg0: i32, %arg1: memref<6xi32, #tpu.memory_space<smem>>) -> (i32, i32) {
    %c0_i32 = arith.constant 0 : i32
    %c0_i32_0 = arith.constant 0 : i32
    %c0_i32_1 = arith.constant 0 : i32
    return %c0_i32, %c0_i32_0 : i32, i32
  }
  func.func @transform_16(%arg0: i32, %arg1: memref<6xi32, #tpu.memory_space<smem>>) -> (i32, i32) {
    %c0_i32 = arith.constant 0 : i32
    %c0_i32_0 = arith.constant 0 : i32
    %c0_i32_1 = arith.constant 0 : i32
    return %c0_i32, %c0_i32_0 : i32, i32
  }
  func.func @transform_17(%arg0: i32, %arg1: memref<6xi32, #tpu.memory_space<smem>>) -> (i32, i32) {
    %c0_i32 = arith.constant 0 : i32
    %c0_i32_0 = arith.constant 0 : i32
    %c0_i32_1 = arith.constant 0 : i32
    return %c0_i32, %c0_i32_0 : i32, i32
  }
}

</mosaic_0001>

<bundles_post_ra>
// kernel: tpu_custom_call.1
= control target key start
LH: loop header
LB: loop body
LE: loop exit
PB: predicated region body
PF: predicated region fallthrough
CT: control target
= control target key end

     0   :  { %s6512_s0 = inlined_call_operand.hbm [shape: s32[6], index: 0, kind: input, shape index: {}]   ;;  %s6513_s1 = inlined_call_operand.vmem [shape: f32[64,32], index: 1, kind: input, shape index: {}]   ;;  %s6514_s2 = inlined_call_operand.vmem [shape: f32[1,32], index: 2, kind: input, shape index: {}]   ;;  %s6515_s3 = inlined_call_operand.vmem [shape: f32[128,32], index: 3, kind: input, shape index: {}]   ;;  %s6516_s4 = inlined_call_operand.vmem [shape: f32[32,128], index: 4, kind: input, shape index: {}]   ;;  %s6517_s5 = inlined_call_operand.vmem [shape: f32[32,128], index: 5, kind: input, shape index: {}]   ;;  %s6518_s6 = inlined_call_operand.vmem [shape: f32[1,128], index: 6, kind: input, shape index: {}]   ;;  %s6519_s7 = inlined_call_operand.vmem [shape: f32[32,32], index: 7, kind: input, shape index: {}]   ;;  %s6520_s8 = inlined_call_operand.vmem [shape: f32[32,32], index: 8, kind: input, shape index: {}]   ;;  %s6521_s9 = inlined_call_operand.vmem [shape: f32[1,32], index: 9, kind: input, shape index: {}]   ;;  %s6522_s10 = inlined_call_operand.vmem [shape: f32[32,96], index: 10, kind: input, shape index: {}]   ;;  %s6523_s11 = inlined_call_operand.vmem [shape: f32[1,96], index: 11, kind: input, shape index: {}]   ;;  %s6524_s12 = inlined_call_operand.vmem [shape: f32[32,96], index: 12, kind: input, shape index: {}]   ;;  %s6525_s13 = inlined_call_operand.vmem [shape: f32[1,96], index: 13, kind: input, shape index: {}]   ;;  %s6526_s14 = inlined_call_operand.vmem [shape: f32[32,128], index: 14, kind: input, shape index: {}]   ;;  %s6527_s15 = inlined_call_operand.vmem [shape: f32[1,128], index: 15, kind: input, shape index: {}]   ;;  %s6528_s16 = inlined_call_operand.hbm [shape: f32[6,128], index: 16, kind: output, shape index: {0}]   ;;  %s6529_s17 = inlined_call_operand.hbm [shape: f32[1,32], index: 17, kind: output, shape index: {1}]   ;;  %s6530_s18 = inlined_call_operand.hbm [shape: f32[6,128], index: 18, kind: output, shape index: {2}]  }
   0x1   :  { %6534 = sst [smem:[#allocation12_spill]] %s6512_s0 }
   0x2   :  { %6535 = sst [smem:[#allocation13_spill]] %s6513_s1  ;;  %s6538_s29 = sld [smem:[#allocation12_spill]] }
   0x3   :  { %6536 = sst [smem:[#allocation14_spill]] %s6514_s2 }
   0x4   :  { %6537 = sst [smem:[#allocation15_spill]] %s6523_s11 }
   0x8   :  { %s5489_s11 = scalar_lea.hbm %s6538_s29, 16 }
   0x9   :  { %p5490_p0 = scmp.ne.s32.totalorder %s6538_s29, %s5489_s11  ;;  %p5493_p1 = scmp.lt.u32.totalorder %s5489_s11, %s6538_s29 }
   0xb   :  { %p5495_p2 = pnand %p5493_p1, %p5490_p0 }
   0xd   :  { %5498 = shalt.err (!%p5495_p2)  }
   0xe   :  { %s5571_s20 = smov [#allocation3]  }
   0xf   :  { %25 = dma.hbm_to_smem %s6538_s29, 16, %s5571_s20, [#allocation2] }
  0x10   :  { %5565 = dma.done.wait [#allocation2], 16 }
  0x11   :  { %5566 = vsyncadd [#allocation2], 4294967280 }
  0x12   :  { %27 = sfence }
  0x13   :  { %28 = vsyncpa [#allocation5], 0  ;;  %v64_v0 = vld [vmem:[%s6517_s5] sm:$0xff]  ;;  %v65_v1 = vld [vmem:[%s6517_s5 + $0x8] sm:$0xff]  ;;  %v5572_v3 = vmov 0.0|0.0   ;;  %s110_s1 = sld [smem:[#allocation3]] }
  0x14   :  { %v60_v2 = vld [vmem:[%s6516_s4] sm:$0xff]  ;;  %4995 = vmatprep.subr.bf16.mxu0 %v5572_v3  ;;  %5001 = vmatprep.subr.bf16.mxu1 %v5572_v3  ;;  %v5699_v4 = vpack.c.bf16 %v65_v1, %v64_v0  ;;  %v61_v5 = vld [vmem:[%s6516_s4 + $0x8] sm:$0xff]  ;;  %v66_v6 = vld [vmem:[%s6517_s5 + $0x10] sm:$0xff]  ;;  %vm5573_vm0 = vmmov 0   ;;  %v5574_v11 = vmov 0.0  }
  0x15   :  { %v67_v7 = vld [vmem:[%s6517_s5 + $0x18] sm:$0xff]  ;;  %v5710_v8 = vpack.c.bf16 %v61_v5, %v60_v2  ;;  %v62_v9 = vld [vmem:[%s6516_s4 + $0x10] sm:$0xff]  ;;  %4331 = vmatprep.mubr.msk.f32.mxu0 %vm5573_vm0, %v5574_v11  ;;  %4342 = vmatprep.mubr.msk.f32.mxu1 %vm5573_vm0, %v5574_v11 }
  0x16   :  { %v63_v10 = vld [vmem:[%s6516_s4 + $0x18] sm:$0xff]  ;;  %4997 = vmatpush3.bf16.msra.mxu0 %v5699_v4  ;;  %v5723_v12 = vpack.c.bf16 %v67_v7, %v66_v6 }
  0x17   :  { %29 = vsyncpa [#allocation7], 0  ;;  %5003 = vmatpush3.bf16.msra.mxu1 %v5710_v8  ;;  %4998 = vmatprep.subr.bf16.mxu0 %v5572_v3  ;;  %v5727_v13 = vpack.c.bf16 %v63_v10, %v62_v9  ;;  %s6539_s23 = sld [smem:[#allocation14_spill]]  ;;  %vm113_vm1 = vcmask 261120   ;;  %s6540_s11 = sld [smem:[#allocation13_spill]]  ;;  %vm261_vm2 = vcmask 1040384  }
  0x18   :  { %5004 = vmatprep.subr.bf16.mxu1 %v5572_v3  ;;  %v5755_v19 = vld [vmem:[%s6518_s6] sm:$0x1]  ;;  %v94_v25 = vld [vmem:[%s6515_s3 + $0x8] sm:$0xff]  ;;  %v95_v26 = vld [vmem:[%s6515_s3 + $0x10] sm:$0xff]  ;;  %s5575_s5 = smov 64   ;;  %s6541_s24 = sld [smem:[#allocation15_spill]] }
  0x19   :  { %v93_v24 = vld [vmem:[%s6515_s3] sm:$0xff]  ;;  %v96_v28 = vld [vmem:[%s6515_s3 + $0x18] sm:$0xff]  ;;  %v98_v31 = vld [vmem:[%s6515_s3 + $0x28] sm:$0xff]  ;;  %s5576_s25 = smov 32   ;;  %s3975_s21 = sld [smem:[#allocation3 + $0x2]]  ;;  %vm3909_vm3 = vcmask 253952  }
  0x1a   :  { %5000 = vmatpush3.bf16.msra.mxu0 %v5723_v12  ;;  %v5768_v27 = vpack.c.bf16 %v94_v25, %v93_v24  ;;  %v5774_v29 = vpack.c.bf16 %v96_v28, %v95_v26  ;;  %v97_v30 = vld [vmem:[%s6515_s3 + $0x20] sm:$0xff]  ;;  %v99_v33 = vld [vmem:[%s6515_s3 + $0x30] sm:$0xff]  ;;  %v100_v34 = vld [vmem:[%s6515_s3 + $0x38] sm:$0xff]  ;;  %s3984_s4 = sld [smem:[#allocation3 + $0x3]] }
  0x1b   :  { %5006 = vmatpush3.bf16.msra.mxu1 %v5727_v13  ;;  %5007 = vmatprep.subr.bf16.mxu0 %v5572_v3  ;;  %v5784_v32 = vpack.c.bf16 %v98_v31, %v97_v30  ;;  %v5794_v35 = vpack.c.bf16 %v100_v34, %v99_v33  ;;  %v101_v36 = vld [vmem:[%s6515_s3 + $0x40] sm:$0xff]  ;;  %v102_v37 = vld [vmem:[%s6515_s3 + $0x48] sm:$0xff]  ;;  %v103_v44 = vld [vmem:[%s6515_s3 + $0x50] sm:$0xff] }
  0x1c   :  { %5031 = vmatprep.subr.bf16.mxu1 %v5572_v3  ;;  %v5804_v38 = vpack.c.bf16 %v102_v37, %v101_v36  ;;  %v104_v45 = vld [vmem:[%s6515_s3 + $0x58] sm:$0xff]  ;;  %v105_v47 = vld [vmem:[%s6515_s3 + $0x60] sm:$0xff]  ;;  %v106_v48 = vld [vmem:[%s6515_s3 + $0x68] sm:$0xff] }
  0x1d   :  { %v5734_v14 = vld [vmem:[%s6539_s23] sm:$0x1]  ;;  %s111_s26 = scalar_lea.vmem %s6540_s11, %s110_s1  ;;  %v5816_v46 = vpack.c.bf16 %v104_v45, %v103_v44  ;;  %v5825_v49 = vpack.c.bf16 %v106_v48, %v105_v47  ;;  %v107_v50 = vld [vmem:[%s6515_s3 + $0x70] sm:$0xff]  ;;  %v108_v51 = vld [vmem:[%s6515_s3 + $0x78] sm:$0xff]  ;;  %s5577_s1 = smov 96  }
  0x1e   :  { %v5740_v15 = vld [vmem:[%s111_s26] sm:$0x1]  ;;  %4332 = vmatmul.mubr.msk.f32.vlgmr.msra.gmra.mrb[0].mxu0 %vm113_vm1, %v5734_v14  ;;  %v5835_v52 = vpack.c.bf16 %v108_v51, %v107_v50  ;;  %v74_v54 = vld [vmem:[%s6520_s8 + $0x8] sm:$0xff]  ;;  %v75_v55 = vld [vmem:[%s6520_s8 + $0x10] sm:$0xff]  ;;  %s3993_s26 = sld [smem:[#allocation3 + $0x4]] }
  0x1f   :  { %4343 = vmatmul.mubr.msk.f32.vlgmr.msra.gmra.mrb[0].mxu1 %vm113_vm1, %v5740_v15  ;;  %4377 = vmatprep.mubr.msk.f32.mxu0 %vm5573_vm0, %v5574_v11  ;;  %v73_v53 = vld [vmem:[%s6520_s8] sm:$0xff]  ;;  %v76_v57 = vld [vmem:[%s6520_s8 + $0x18] sm:$0xff]  ;;  %v70_v63 = vld [vmem:[%s6519_s7 + $0x8] sm:$0xff] }
  0x20   :  { %4388 = vmatprep.mubr.msk.f32.mxu1 %vm5573_vm0, %v5574_v11  ;;  %5009 = vmatpush3.bf16.msra.mxu0 %v5768_v27  ;;  %v5849_v56 = vpack.c.bf16 %v74_v54, %v73_v53  ;;  %v5855_v58 = vpack.c.bf16 %v76_v57, %v75_v55  ;;  %v69_v62 = vld [vmem:[%s6519_s7] sm:$0xff]  ;;  %v71_v1 = vld [vmem:[%s6519_s7 + $0x10] sm:$0xff]  ;;  %v72_v2 = vld [vmem:[%s6519_s7 + $0x18] sm:$0xff]  ;;  %v656_v54 = vlaneseq }
  0x21   :  { %5010 = vmatprep.subr.bf16.mxu0 %v5572_v3  ;;  %v5868_v0 = vpack.c.bf16 %v70_v63, %v69_v62  ;;  %v5878_v7 = vpack.c.bf16 %v72_v2, %v71_v1  ;;  %v78_v9 = vld [vmem:[%s6522_s10] sm:$0xff]  ;;  %v79_v10 = vld [vmem:[%s6522_s10 + $0x8] sm:$0xff]  ;;  %v85_v34 = vld [vmem:[%s6524_s12 + $0x10] sm:$0xff] }
  0x22   :  { %5033 = vmatpush3.bf16.msra.mxu1 %v5849_v56  ;;  %v83_v26 = vld [vmem:[%s6524_s12] sm:$0xff]  ;;  %v84_v28 = vld [vmem:[%s6524_s12 + $0x8] sm:$0xff]  ;;  %v86_v36 = vld [vmem:[%s6524_s12 + $0x18] sm:$0xff]  ;;  %v657_v55 = vshrl.u32 %v656_v54, 7  ;;  %s1385_s12 = scalar_lea.vmem %s6540_s11, %s3975_s21 }
  0x23   :  { %5034 = vmatprep.subr.bf16.mxu1 %v5572_v3  ;;  %v5921_v31 = vpack.c.bf16 %v84_v28, %v83_v26  ;;  %v5931_v37 = vpack.c.bf16 %v86_v36, %v85_v34  ;;  %v5956_v45 = vld [vmem:[%s6541_s24] sm:$0x1] }
  0x24   :  { %5012 = vmatpush3.bf16.msra.mxu0 %v5774_v29  ;;  %v658_v57 = vsub.s32 0, %v657_v55  ;;  %v88_v2 = vld [vmem:[%s6526_s14] sm:$0xff]  ;;  %s2647_s29 = scalar_lea.vmem %s6540_s11, %s3993_s26 }
  0x25   :  { %5013 = vmatprep.subr.bf16.mxu0 %v5572_v3 }
  0x26   :  { %5036 = vmatpush3.bf16.msra.mxu1 %v5855_v58  ;;  %v659_v62 = vrot.slane %v5734_v14, %v658_v57 }
  0x27   :  { %5037 = vmatprep.subr.bf16.mxu1 %v5572_v3 }
  0x28   :  { %5015 = vmatpush3.bf16.msra.mxu0 %v5784_v32 }
  0x29   :  { %5016 = vmatprep.subr.bf16.mxu0 %v5572_v3 }
  0x2c   :  { %5018 = vmatpush3.bf16.msra.mxu0 %v5794_v35 }
  0x2d   :  { %5019 = vmatprep.subr.bf16.mxu0 %v5572_v3 }
  0x30   :  { %5021 = vmatpush3.bf16.msra.mxu0 %v5804_v38 }
  0x31   :  { %5022 = vmatprep.subr.bf16.mxu0 %v5572_v3 }
  0x34   :  { %5024 = vmatpush3.bf16.msra.mxu0 %v5816_v46 }
  0x35   :  { %5025 = vmatprep.subr.bf16.mxu0 %v5572_v3 }
  0x38   :  { %5027 = vmatpush3.bf16.msra.mxu0 %v5825_v49 }
  0x39   :  { %5028 = vmatprep.subr.bf16.mxu0 %v5572_v3 }
  0x3c   :  { %5030 = vmatpush3.bf16.msra.mxu0 %v5835_v52 }
  0x3d   :  { %5055 = vmatprep.subr.bf16.mxu0 %v5572_v3 }
  0xf1   :  { %v183_v16 = vpop.f32.mrb[0].mxu0 }
  0xf2   :  { %v256_v17 = vpop.f32.mrb[0].mxu1  ;;  %v4333_v18 = vpop.f32.mrb[1].mxu0 }
  0xf3   :  { %v257_v20 = vadd.f32 %v256_v17, %v183_v16  ;;  %v4344_v21 = vpop.f32.mrb[1].mxu1  ;;  %v5895_v16 = vpack.c.bf16 %v79_v10, %v78_v9  ;;  %v81_v17 = vld [vmem:[%s6522_s10 + $0x18] sm:$0xff] }
  0xf5   :  { %v260_v22 = vadd.f32 %v257_v20, %v5755_v19 }
  0xf7   :  { %v262_v23 = vsel %vm261_vm2, %v260_v22, -inf }
  0xf8   :  { %263 = vmax.xlane.f32.xlu0 %v262_v23 }
 0x185   :  { %v264_v39 = vpop.xlane.xlu0 %263 }
 0x186   :  { %v265_v40 = vsub.f32 %v260_v22, %v264_v39  ;;  %v5912_v22 = vld [vmem:[%s6521_s9] sm:$0x1] }
 0x188   :  { %v266_v41 = vmul.f32 1.442695, %v265_v40 }
 0x18a   :  { %5401 = vpow2.f32 %v266_v41  ;;  %v5949_v41 = vld [vmem:[%s6525_s13] sm:$0x1] }
 0x194   :  { %v5402_v42 = vpop.eup %5401 }
 0x195   :  { %v268_v43 = vsel %vm261_vm2, %v5402_v42, 0.0 }
 0x196   :  { %269 = vadd.xlane.f32.xlu0 %v268_v43 }
 0x223   :  { %v270_v59 = vpop.xlane.xlu0 %269 }
 0x224   :  { %5403 = vrcp.f32 %v270_v59 }
 0x22e   :  { %v5404_v60 = vpop.eup %5403 }
 0x22f   :  { %v272_v61 = vmul.f32 %v5404_v60, %v5402_v42 }
 0x231   :  { %273 = vst [vmem:[#allocation8] sm:$0x1] %v272_v61  ;;  %4378 = vmatmul.mubr.f32.vlgmr.msra.gmra.mrb[2].mxu0 %v272_v61 }
 0x232   :  { %4432 = vmatprep.mubr.msk.f32.mxu0 %vm5573_vm0, %v5574_v11 }
 0x304   :  { %v340_v5 = vpop.f32.mrb[2].mxu0 }
 0x305   :  { %v4379_v6 = vpop.f32.mrb[3].mxu0  ;;  %4389 = vmatmul.mubr.msk.f32.vlgmr.msra.gmra.mrb[2].mxu1 %vm113_vm1, %v340_v5  ;;  %v89_v5 = vld [vmem:[%s6526_s14 + $0x8] sm:$0xff] }
 0x306   :  { %5039 = vmatpush3.bf16.msra.mxu1 %v5868_v0  ;;  %4399 = vmatprep.mubr.msk.f32.mxu1 %vm5573_vm0, %v5574_v11  ;;  %v90_v6 = vld [vmem:[%s6526_s14 + $0x10] sm:$0xff]  ;;  %v5970_v9 = vpack.c.bf16 %v89_v5, %v88_v2 }
 0x307   :  { %5040 = vmatprep.subr.bf16.mxu1 %v5572_v3 }
 0x308   :  { %5057 = vmatpush3.bf16.msra.mxu0 %v5970_v9 }
 0x309   :  { %5058 = vmatprep.subr.bf16.mxu0 %v5572_v3 }
 0x30a   :  { %5042 = vmatpush3.bf16.msra.mxu1 %v5878_v7 }
 0x30b   :  { %5043 = vmatprep.subr.bf16.mxu1 %v5572_v3 }
 0x30d   :  { %4400 = vmatmul.mubr.msk.f32.vlgmr.msra.gmra.mrb[4].mxu1 %vm113_vm1, %v5740_v15  ;;  %v80_v15 = vld [vmem:[%s6522_s10 + $0x10] sm:$0xff] }
 0x30e   :  { %4410 = vmatprep.mubr.msk.f32.mxu1 %vm5573_vm0, %v5574_v11  ;;  %5045 = vmatpush3.bf16.msra.mxu1 %v5895_v16  ;;  %v5905_v18 = vpack.c.bf16 %v81_v17, %v80_v15 }
 0x30f   :  { %5046 = vmatprep.subr.bf16.mxu1 %v5572_v3 }
 0x312   :  { %5048 = vmatpush3.bf16.msra.mxu1 %v5905_v18 }
 0x313   :  { %5049 = vmatprep.subr.bf16.mxu1 %v5572_v3 }
 0x3d8   :  { %v413_v20 = vpop.f32.mrb[2].mxu1 }
 0x3d9   :  { %v4390_v21 = vpop.f32.mrb[3].mxu1 }
 0x3e0   :  { %v483_v23 = vpop.f32.mrb[4].mxu1 }
 0x3e1   :  { %v484_v24 = vadd.f32 %v483_v23, %v413_v20  ;;  %v4401_v25 = vpop.f32.mrb[5].mxu1 }
 0x3e3   :  { %v487_v30 = vadd.f32 %v484_v24, %v5912_v22 }
 0x3e5   :  { %v488_v33 = vmax.f32 %v487_v30, 0.0 }
 0x3e7   :  { %4411 = vmatmul.mubr.msk.f32.vlgmr.msra.gmra.mrb[6].mxu1 %vm113_vm1, %v488_v33 }
 0x3e8   :  { %5051 = vmatpush3.bf16.msra.mxu1 %v5921_v31  ;;  %4421 = vmatprep.mubr.msk.f32.mxu1 %vm5573_vm0, %v5574_v11 }
 0x3e9   :  { %5052 = vmatprep.subr.bf16.mxu1 %v5572_v3 }
 0x3ec   :  { %5054 = vmatpush3.bf16.msra.mxu1 %v5931_v37 }
 0x3ed   :  { %5061 = vmatprep.subr.bf16.mxu1 %v5572_v3 }
 0x3ef   :  { %4422 = vmatmul.mubr.msk.f32.vlgmr.msra.gmra.mrb[8].mxu1 %vm113_vm1, %v5734_v14  ;;  %v91_v14 = vld [vmem:[%s6526_s14 + $0x18] sm:$0xff]  ;;  %s3966_s14 = sld [smem:[#allocation3 + $0x1]] }
 0x3f0   :  { %5063 = vmatpush3.bf16.msra.mxu1 %v5699_v4  ;;  %4443 = vmatprep.mubr.msk.f32.mxu1 %vm5573_vm0, %v5574_v11  ;;  %v5976_v10 = vpack.c.bf16 %v91_v14, %v90_v6 }
 0x3f1   :  { %5064 = vmatprep.subr.bf16.mxu1 %v5572_v3 }
 0x3f2   :  { %5060 = vmatpush3.bf16.msra.mxu0 %v5976_v10 }
 0x3f3   :  { %5067 = vmatprep.subr.bf16.mxu0 %v5572_v3 }
 0x3f4   :  { %5066 = vmatpush3.bf16.msra.mxu1 %v5723_v12 }
 0x3f5   :  { %5073 = vmatprep.subr.bf16.mxu1 %v5572_v3  ;;  %s754_s20 = scalar_lea.vmem %s6540_s11, %s3966_s14 }
 0x3f6   :  { %v755_v28 = vld [vmem:[%s754_s20] sm:$0x1] }
 0x4ba   :  { %v558_v39 = vpop.f32.mrb[6].mxu1 }
 0x4bb   :  { %v4412_v40 = vpop.f32.mrb[7].mxu1  ;;  %v559_v47 = vadd.f32 %v558_v39, %v5956_v45 }
 0x4c2   :  { %v628_v42 = vpop.f32.mrb[8].mxu1 }
 0x4c3   :  { %v629_v43 = vadd.f32 %v628_v42, %v5949_v41  ;;  %v4423_v44 = vpop.f32.mrb[9].mxu1 }
 0x4c5   :  { %640 = vrot.lane.b32.xlu1 %v629_v43, %s5575_s5  ;;  %v632_v48 = vadd.f32 %v629_v43, %v559_v47 }
 0x4c7   :  { %v3964_v50 = vmul.f32 -1.442695, %v632_v48 }
 0x4c9   :  { %5405 = vpow2.f32 %v3964_v50 }
 0x4d3   :  { %v5406_v51 = vpop.eup %5405 }
 0x4d4   :  { %v636_v53 = vadd.f32 1.0, %v5406_v51 }
 0x4d6   :  { %5407 = vrcp.f32 %v636_v53 }
 0x4e0   :  { %v5408_v59 = vpop.eup %5407 }
 0x4e1   :  { %v650_v20 = vsub.f32 1.0, %v5408_v59 }
 0x537   :  { %v641_v60 = vpop.permute.xlu1 %640 }
 0x538   :  { %v643_v61 = vmul.f32 %v5408_v59, %v641_v60 }
 0x53a   :  { %645 = vrot.lane.b32.xlu1 %v643_v61, %s5575_s5 }
 0x53e   :  { %660 = vrot.lane.b32.xlu1 %v659_v62, %s5576_s25  ;;  %s2016_s25 = scalar_lea.vmem %s6540_s11, %s3984_s4 }
 0x5ac   :  { %v646_v63 = vpop.permute.xlu1 %645 }
 0x5ad   :  { %v648_v1 = vadd.f32 %v646_v63, %v559_v47 }
 0x5af   :  { %5409 = vtanh.f32 %v648_v1 }
 0x5b0   :  { %v661_v17 = vpop.permute.xlu1 %660 }
 0x5b1   :  { %v663_v23 = vmul.f32 %v5408_v59, %v661_v17 }
 0x5b9   :  { %v5410_v15 = vpop.eup %5409 }
 0x5ba   :  { %652 = vrot.lane.b32.xlu0 %v5410_v15, %s5577_s1 }
 0x62c   :  { %v653_v21 = vpop.permute.xlu0 %652 }
 0x62d   :  { %v655_v24 = vmul.f32 %v653_v21, %v650_v20 }
 0x62f   :  { %v5982_v25 = vadd.f32 %v663_v23, %v655_v24 }
 0x631   :  { %666 = vrot.lane.b32.xlu1 %v5982_v25, %s5577_s1 }
 0x6a3   :  { %v5986_v26 = vpop.permute.xlu1 %666 }
 0x6a4   :  { %4433 = vmatmul.mubr.msk.f32.vlgmr.msra.gmra.mrb[4].mxu0 %vm113_vm1, %v5986_v26  ;;  %4444 = vmatmul.mubr.msk.f32.vlgmr.msra.gmra.mrb[10].mxu1 %vm113_vm1, %v5986_v26 }
 0x6a5   :  { %5069 = vmatpush3.bf16.msra.mxu0 %v5710_v8  ;;  %4454 = vmatprep.mubr.msk.f32.mxu0 %vm5573_vm0, %v5574_v11 }
 0x6a6   :  { %5070 = vmatprep.subr.bf16.mxu0 %v5572_v3  ;;  %5075 = vmatpush3.bf16.msra.mxu1 %v5768_v27 }
 0x6a7   :  { %5076 = vmatprep.subr.bf16.mxu1 %v5572_v3  ;;  %4489 = vmatprep.mubr.msk.f32.mxu1 %vm5573_vm0, %v5574_v11 }
 0x6a9   :  { %5072 = vmatpush3.bf16.msra.mxu0 %v5727_v13 }
 0x6aa   :  { %5078 = vmatpush3.bf16.msra.mxu1 %v5774_v29  ;;  %5097 = vmatprep.subr.bf16.mxu0 %v5572_v3 }
 0x6ab   :  { %5079 = vmatprep.subr.bf16.mxu1 %v5572_v3 }
 0x6ac   :  { %4455 = vmatmul.mubr.msk.f32.vlgmr.msra.gmra.mrb[6].mxu0 %vm113_vm1, %v755_v28 }
 0x6ad   :  { %5099 = vmatpush3.bf16.msra.mxu0 %v5849_v56  ;;  %4500 = vmatprep.mubr.msk.f32.mxu0 %vm5573_vm0, %v5574_v11 }
 0x6ae   :  { %5081 = vmatpush3.bf16.msra.mxu1 %v5784_v32  ;;  %5100 = vmatprep.subr.bf16.mxu0 %v5572_v3 }
 0x6af   :  { %5082 = vmatprep.subr.bf16.mxu1 %v5572_v3 }
 0x6b1   :  { %5102 = vmatpush3.bf16.msra.mxu0 %v5855_v58 }
 0x6b2   :  { %5084 = vmatpush3.bf16.msra.mxu1 %v5794_v35  ;;  %5103 = vmatprep.subr.bf16.mxu0 %v5572_v3 }
 0x6b3   :  { %5085 = vmatprep.subr.bf16.mxu1 %v5572_v3 }
 0x6b6   :  { %5087 = vmatpush3.bf16.msra.mxu1 %v5804_v38 }
 0x6b7   :  { %5088 = vmatprep.subr.bf16.mxu1 %v5572_v3 }
 0x6ba   :  { %5090 = vmatpush3.bf16.msra.mxu1 %v5816_v46 }
 0x6bb   :  { %5091 = vmatprep.subr.bf16.mxu1 %v5572_v3 }
 0x6be   :  { %5093 = vmatpush3.bf16.msra.mxu1 %v5825_v49 }
 0x6bf   :  { %5094 = vmatprep.subr.bf16.mxu1 %v5572_v3 }
 0x6c2   :  { %5096 = vmatpush3.bf16.msra.mxu1 %v5835_v52 }
 0x6c3   :  { %5121 = vmatprep.subr.bf16.mxu1 %v5572_v3 }
 0x777   :  { %v6026_v30 = vpop.f32.mrb[4].mxu0  ;;  %v822_v33 = vpop.f32.mrb[10].mxu1 }
 0x778   :  { %v4434_v34 = vpop.f32.mrb[5].mxu0  ;;  %v4445_v36 = vpop.f32.mrb[11].mxu1 }
 0x77f   :  { %v895_v39 = vpop.f32.mrb[6].mxu0 }
 0x780   :  { %v896_v40 = vadd.f32 %v895_v39, %v822_v33  ;;  %v4456_v42 = vpop.f32.mrb[7].mxu0 }
 0x782   :  { %v899_v43 = vadd.f32 %v896_v40, %v5755_v19 }
 0x784   :  { %v900_v44 = vsel %vm261_vm2, %v899_v43, -inf }
 0x785   :  { %901 = vmax.xlane.f32.xlu1 %v900_v44 }
 0x812   :  { %v902_v47 = vpop.xlane.xlu1 %901 }
 0x813   :  { %v903_v48 = vsub.f32 %v899_v43, %v902_v47 }
 0x815   :  { %v904_v50 = vmul.f32 1.442695, %v903_v48 }
 0x817   :  { %5411 = vpow2.f32 %v904_v50 }
 0x821   :  { %v5412_v51 = vpop.eup %5411 }
 0x822   :  { %v906_v53 = vsel %vm261_vm2, %v5412_v51, 0.0 }
 0x823   :  { %907 = vadd.xlane.f32.xlu0 %v906_v53 }
 0x8b0   :  { %v908_v54 = vpop.xlane.xlu0 %907 }
 0x8b1   :  { %5413 = vrcp.f32 %v908_v54 }
 0x8bb   :  { %v5414_v55 = vpop.eup %5413 }
 0x8bc   :  { %v910_v57 = vmul.f32 %v5414_v55, %v5412_v51 }
 0x8be   :  { %911 = vst [vmem:[#allocation8 + $0x1] sm:$0x1] %v910_v57  ;;  %4490 = vmatmul.mubr.f32.vlgmr.msra.gmra.mrb[12].mxu1 %v910_v57 }
 0x8bf   :  { %5123 = vmatpush3.bf16.msra.mxu1 %v5970_v9  ;;  %4544 = vmatprep.mubr.msk.f32.mxu1 %vm5573_vm0, %v5574_v11 }
 0x8c0   :  { %5124 = vmatprep.subr.bf16.mxu1 %v5572_v3 }
 0x8c3   :  { %5126 = vmatpush3.bf16.msra.mxu1 %v5976_v10 }
 0x8c4   :  { %5133 = vmatprep.subr.bf16.mxu1 %v5572_v3 }
 0x991   :  { %v978_v59 = vpop.f32.mrb[12].mxu1 }
 0x992   :  { %v4491_v60 = vpop.f32.mrb[13].mxu1  ;;  %4501 = vmatmul.mubr.msk.f32.vlgmr.msra.gmra.mrb[8].mxu0 %vm113_vm1, %v978_v59 }
 0x993   :  { %5105 = vmatpush3.bf16.msra.mxu0 %v5868_v0  ;;  %4511 = vmatprep.mubr.msk.f32.mxu0 %vm5573_vm0, %v5574_v11 }
 0x994   :  { %5106 = vmatprep.subr.bf16.mxu0 %v5572_v3 }
 0x997   :  { %5108 = vmatpush3.bf16.msra.mxu0 %v5878_v7 }
 0x998   :  { %5109 = vmatprep.subr.bf16.mxu0 %v5572_v3 }
 0x99a   :  { %4512 = vmatmul.mubr.msk.f32.vlgmr.msra.gmra.mrb[10].mxu0 %vm113_vm1, %v755_v28 }
 0x99b   :  { %5111 = vmatpush3.bf16.msra.mxu0 %v5895_v16  ;;  %4522 = vmatprep.mubr.msk.f32.mxu0 %vm5573_vm0, %v5574_v11 }
 0x99c   :  { %5112 = vmatprep.subr.bf16.mxu0 %v5572_v3 }
 0x99f   :  { %5114 = vmatpush3.bf16.msra.mxu0 %v5905_v18 }
 0x9a0   :  { %5115 = vmatprep.subr.bf16.mxu0 %v5572_v3 }
 0xa65   :  { %v1051_v61 = vpop.f32.mrb[8].mxu0 }
 0xa66   :  { %v4502_v62 = vpop.f32.mrb[9].mxu0 }
 0xa6d   :  { %v1121_v63 = vpop.f32.mrb[10].mxu0 }
 0xa6e   :  { %v1122_v1 = vadd.f32 %v1121_v63, %v1051_v61  ;;  %v4513_v2 = vpop.f32.mrb[11].mxu0 }
 0xa70   :  { %v1125_v5 = vadd.f32 %v1122_v1, %v5912_v22 }
 0xa72   :  { %v1126_v6 = vmax.f32 %v1125_v5, 0.0 }
 0xa74   :  { %4523 = vmatmul.mubr.msk.f32.vlgmr.msra.gmra.mrb[12].mxu0 %vm113_vm1, %v1126_v6 }
 0xa75   :  { %5117 = vmatpush3.bf16.msra.mxu0 %v5921_v31  ;;  %4533 = vmatprep.mubr.msk.f32.mxu0 %vm5573_vm0, %v5574_v11 }
 0xa76   :  { %5118 = vmatprep.subr.bf16.mxu0 %v5572_v3 }
 0xa79   :  { %5120 = vmatpush3.bf16.msra.mxu0 %v5931_v37 }
 0xa7a   :  { %5127 = vmatprep.subr.bf16.mxu0 %v5572_v3 }
 0xa7c   :  { %4534 = vmatmul.mubr.msk.f32.vlgmr.msra.gmra.mrb[14].mxu0 %vm113_vm1, %v5986_v26 }
 0xa7d   :  { %5129 = vmatpush3.bf16.msra.mxu0 %v5699_v4  ;;  %4555 = vmatprep.mubr.msk.f32.mxu0 %vm5573_vm0, %v5574_v11 }
 0xa7e   :  { %5130 = vmatprep.subr.bf16.mxu0 %v5572_v3 }
 0xa81   :  { %5132 = vmatpush3.bf16.msra.mxu0 %v5723_v12 }
 0xa82   :  { %5139 = vmatprep.subr.bf16.mxu0 %v5572_v3 }
 0xb47   :  { %v1196_v14 = vpop.f32.mrb[12].mxu0 }
 0xb48   :  { %v4524_v15 = vpop.f32.mrb[13].mxu0  ;;  %v1197_v23 = vadd.f32 %v1196_v14, %v5956_v45 }
 0xb4f   :  { %v1266_v17 = vpop.f32.mrb[14].mxu0 }
 0xb50   :  { %v1267_v20 = vadd.f32 %v1266_v17, %v5949_v41  ;;  %v4535_v21 = vpop.f32.mrb[15].mxu0 }
 0xb52   :  { %1278 = vrot.lane.b32.xlu1 %v1267_v20, %s5575_s5  ;;  %v1270_v24 = vadd.f32 %v1267_v20, %v1197_v23 }
 0xb54   :  { %v3973_v26 = vmul.f32 -1.442695, %v1270_v24 }
 0xb56   :  { %5415 = vpow2.f32 %v3973_v26 }
 0xb60   :  { %v5416_v28 = vpop.eup %5415 }
 0xb61   :  { %v1274_v33 = vadd.f32 1.0, %v5416_v28 }
 0xb63   :  { %5417 = vrcp.f32 %v1274_v33 }
 0xb6d   :  { %v5418_v34 = vpop.eup %5417 }
 0xb6e   :  { %v1288_v44 = vsub.f32 1.0, %v5418_v34  ;;  %v1294_v48 = vmul.f32 %v5418_v34, %v5982_v25  ;;  %v1386_v25 = vld [vmem:[%s1385_s12] sm:$0x1] }
 0xbc4   :  { %v1279_v36 = vpop.permute.xlu1 %1278 }
 0xbc5   :  { %v1281_v39 = vmul.f32 %v5418_v34, %v1279_v36 }
 0xbc7   :  { %1283 = vrot.lane.b32.xlu0 %v1281_v39, %s5575_s5 }
 0xc39   :  { %v1284_v40 = vpop.permute.xlu0 %1283 }
 0xc3a   :  { %v1286_v42 = vadd.f32 %v1284_v40, %v1197_v23 }
 0xc3c   :  { %5419 = vtanh.f32 %v1286_v42 }
 0xc46   :  { %v5420_v43 = vpop.eup %5419 }
 0xc47   :  { %1290 = vrot.lane.b32.xlu1 %v5420_v43, %s5577_s1 }
 0xcb9   :  { %v1291_v47 = vpop.permute.xlu1 %1290 }
 0xcba   :  { %v1293_v50 = vmul.f32 %v1291_v47, %v1288_v44 }
 0xcbc   :  { %v6073_v51 = vadd.f32 %v1294_v48, %v1293_v50 }
 0xcbe   :  { %1297 = vrot.lane.b32.xlu1 %v6073_v51, %s5577_s1 }
 0xd30   :  { %v6077_v53 = vpop.permute.xlu1 %1297 }
 0xd31   :  { %4545 = vmatmul.mubr.msk.f32.vlgmr.msra.gmra.mrb[14].mxu1 %vm113_vm1, %v6077_v53  ;;  %4556 = vmatmul.mubr.msk.f32.vlgmr.msra.gmra.mrb[16].mxu0 %vm113_vm1, %v6077_v53 }
 0xd32   :  { %5135 = vmatpush3.bf16.msra.mxu1 %v5710_v8  ;;  %4566 = vmatprep.mubr.msk.f32.mxu1 %vm5573_vm0, %v5574_v11 }
 0xd33   :  { %5136 = vmatprep.subr.bf16.mxu1 %v5572_v3  ;;  %5141 = vmatpush3.bf16.msra.mxu0 %v5768_v27 }
 0xd34   :  { %5142 = vmatprep.subr.bf16.mxu0 %v5572_v3  ;;  %4601 = vmatprep.mubr.msk.f32.mxu0 %vm5573_vm0, %v5574_v11 }
 0xd36   :  { %5138 = vmatpush3.bf16.msra.mxu1 %v5727_v13 }
 0xd37   :  { %5144 = vmatpush3.bf16.msra.mxu0 %v5774_v29  ;;  %5163 = vmatprep.subr.bf16.mxu1 %v5572_v3 }
 0xd38   :  { %5145 = vmatprep.subr.bf16.mxu0 %v5572_v3 }
 0xd39   :  { %4567 = vmatmul.mubr.msk.f32.vlgmr.msra.gmra.mrb[16].mxu1 %vm113_vm1, %v1386_v25 }
 0xd3a   :  { %5165 = vmatpush3.bf16.msra.mxu1 %v5849_v56  ;;  %4612 = vmatprep.mubr.msk.f32.mxu1 %vm5573_vm0, %v5574_v11 }
 0xd3b   :  { %5147 = vmatpush3.bf16.msra.mxu0 %v5784_v32  ;;  %5166 = vmatprep.subr.bf16.mxu1 %v5572_v3 }
 0xd3c   :  { %5148 = vmatprep.subr.bf16.mxu0 %v5572_v3 }
 0xd3e   :  { %5168 = vmatpush3.bf16.msra.mxu1 %v5855_v58 }
 0xd3f   :  { %5150 = vmatpush3.bf16.msra.mxu0 %v5794_v35  ;;  %5169 = vmatprep.subr.bf16.mxu1 %v5572_v3 }
 0xd40   :  { %5151 = vmatprep.subr.bf16.mxu0 %v5572_v3 }
 0xd43   :  { %5153 = vmatpush3.bf16.msra.mxu0 %v5804_v38 }
 0xd44   :  { %5154 = vmatprep.subr.bf16.mxu0 %v5572_v3 }
 0xd47   :  { %5156 = vmatpush3.bf16.msra.mxu0 %v5816_v46 }
 0xd48   :  { %5157 = vmatprep.subr.bf16.mxu0 %v5572_v3 }
 0xd4b   :  { %5159 = vmatpush3.bf16.msra.mxu0 %v5825_v49 }
 0xd4c   :  { %5160 = vmatprep.subr.bf16.mxu0 %v5572_v3 }
 0xd4f   :  { %5162 = vmatpush3.bf16.msra.mxu0 %v5835_v52 }
 0xd50   :  { %5187 = vmatprep.subr.bf16.mxu0 %v5572_v3 }
 0xe04   :  { %v6117_v54 = vpop.f32.mrb[14].mxu1  ;;  %v1453_v55 = vpop.f32.mrb[16].mxu0 }
 0xe05   :  { %v4546_v57 = vpop.f32.mrb[15].mxu1  ;;  %v4557_v59 = vpop.f32.mrb[17].mxu0 }
 0xe0c   :  { %v1526_v60 = vpop.f32.mrb[16].mxu1 }
 0xe0d   :  { %v1527_v61 = vadd.f32 %v1526_v60, %v1453_v55  ;;  %v4568_v62 = vpop.f32.mrb[17].mxu1 }
 0xe0f   :  { %v1530_v63 = vadd.f32 %v1527_v61, %v5755_v19 }
 0xe11   :  { %v1531_v1 = vsel %vm261_vm2, %v1530_v63, -inf }
 0xe12   :  { %1532 = vmax.xlane.f32.xlu1 %v1531_v1 }
 0xe9f   :  { %v1533_v2 = vpop.xlane.xlu1 %1532 }
 0xea0   :  { %v1534_v5 = vsub.f32 %v1530_v63, %v1533_v2 }
 0xea2   :  { %v1535_v6 = vmul.f32 1.442695, %v1534_v5 }
 0xea4   :  { %5421 = vpow2.f32 %v1535_v6 }
 0xeae   :  { %v5422_v14 = vpop.eup %5421 }
 0xeaf   :  { %v1537_v15 = vsel %vm261_vm2, %v5422_v14, 0.0 }
 0xeb0   :  { %1538 = vadd.xlane.f32.xlu0 %v1537_v15 }
 0xf3d   :  { %v1539_v17 = vpop.xlane.xlu0 %1538 }
 0xf3e   :  { %5423 = vrcp.f32 %v1539_v17 }
 0xf48   :  { %v5424_v20 = vpop.eup %5423 }
 0xf49   :  { %v1541_v21 = vmul.f32 %v5424_v20, %v5422_v14 }
 0xf4b   :  { %1542 = vst [vmem:[#allocation8 + $0x2] sm:$0x1] %v1541_v21  ;;  %4602 = vmatmul.mubr.f32.vlgmr.msra.gmra.mrb[18].mxu0 %v1541_v21 }
 0xf4c   :  { %5189 = vmatpush3.bf16.msra.mxu0 %v5970_v9  ;;  %4656 = vmatprep.mubr.msk.f32.mxu0 %vm5573_vm0, %v5574_v11 }
 0xf4d   :  { %5190 = vmatprep.subr.bf16.mxu0 %v5572_v3 }
 0xf50   :  { %5192 = vmatpush3.bf16.msra.mxu0 %v5976_v10 }
 0xf51   :  { %5199 = vmatprep.subr.bf16.mxu0 %v5572_v3 }
0x101e   :  { %v1609_v23 = vpop.f32.mrb[18].mxu0 }
0x101f   :  { %v4603_v24 = vpop.f32.mrb[19].mxu0  ;;  %4613 = vmatmul.mubr.msk.f32.vlgmr.msra.gmra.mrb[18].mxu1 %vm113_vm1, %v1609_v23 }
0x1020   :  { %5171 = vmatpush3.bf16.msra.mxu1 %v5868_v0  ;;  %4623 = vmatprep.mubr.msk.f32.mxu1 %vm5573_vm0, %v5574_v11 }
0x1021   :  { %5172 = vmatprep.subr.bf16.mxu1 %v5572_v3 }
0x1024   :  { %5174 = vmatpush3.bf16.msra.mxu1 %v5878_v7 }
0x1025   :  { %5175 = vmatprep.subr.bf16.mxu1 %v5572_v3 }
0x1027   :  { %4624 = vmatmul.mubr.msk.f32.vlgmr.msra.gmra.mrb[20].mxu1 %vm113_vm1, %v1386_v25 }
0x1028   :  { %5177 = vmatpush3.bf16.msra.mxu1 %v5895_v16  ;;  %4634 = vmatprep.mubr.msk.f32.mxu1 %vm5573_vm0, %v5574_v11 }
0x1029   :  { %5178 = vmatprep.subr.bf16.mxu1 %v5572_v3 }
0x102c   :  { %5180 = vmatpush3.bf16.msra.mxu1 %v5905_v18 }
0x102d   :  { %5181 = vmatprep.subr.bf16.mxu1 %v5572_v3 }
0x10f2   :  { %v1682_v26 = vpop.f32.mrb[18].mxu1 }
0x10f3   :  { %v4614_v28 = vpop.f32.mrb[19].mxu1 }
0x10fa   :  { %v1752_v33 = vpop.f32.mrb[20].mxu1 }
0x10fb   :  { %v1753_v34 = vadd.f32 %v1752_v33, %v1682_v26  ;;  %v4625_v36 = vpop.f32.mrb[21].mxu1 }
0x10fd   :  { %v1756_v39 = vadd.f32 %v1753_v34, %v5912_v22 }
0x10ff   :  { %v1757_v40 = vmax.f32 %v1756_v39, 0.0 }
0x1101   :  { %4635 = vmatmul.mubr.msk.f32.vlgmr.msra.gmra.mrb[22].mxu1 %vm113_vm1, %v1757_v40 }
0x1102   :  { %5183 = vmatpush3.bf16.msra.mxu1 %v5921_v31  ;;  %4645 = vmatprep.mubr.msk.f32.mxu1 %vm5573_vm0, %v5574_v11 }
0x1103   :  { %5184 = vmatprep.subr.bf16.mxu1 %v5572_v3 }
0x1106   :  { %5186 = vmatpush3.bf16.msra.mxu1 %v5931_v37 }
0x1107   :  { %5193 = vmatprep.subr.bf16.mxu1 %v5572_v3 }
0x1109   :  { %4646 = vmatmul.mubr.msk.f32.vlgmr.msra.gmra.mrb[24].mxu1 %vm113_vm1, %v6077_v53 }
0x110a   :  { %5195 = vmatpush3.bf16.msra.mxu1 %v5699_v4  ;;  %4667 = vmatprep.mubr.msk.f32.mxu1 %vm5573_vm0, %v5574_v11 }
0x110b   :  { %5196 = vmatprep.subr.bf16.mxu1 %v5572_v3 }
0x110e   :  { %5198 = vmatpush3.bf16.msra.mxu1 %v5723_v12 }
0x110f   :  { %5205 = vmatprep.subr.bf16.mxu1 %v5572_v3 }
0x11d4   :  { %v1827_v42 = vpop.f32.mrb[22].mxu1 }
0x11d5   :  { %v4636_v43 = vpop.f32.mrb[23].mxu1  ;;  %v1828_v50 = vadd.f32 %v1827_v42, %v5956_v45 }
0x11dc   :  { %v1897_v44 = vpop.f32.mrb[24].mxu1 }
0x11dd   :  { %v1898_v47 = vadd.f32 %v1897_v44, %v5949_v41  ;;  %v4647_v48 = vpop.f32.mrb[25].mxu1 }
0x11df   :  { %1909 = vrot.lane.b32.xlu1 %v1898_v47, %s5575_s5  ;;  %v1901_v53 = vadd.f32 %v1898_v47, %v1828_v50 }
0x11e1   :  { %v3982_v25 = vmul.f32 -1.442695, %v1901_v53 }
0x11e3   :  { %5425 = vpow2.f32 %v3982_v25 }
0x11ed   :  { %v5426_v55 = vpop.eup %5425 }
0x11ee   :  { %v1905_v57 = vadd.f32 1.0, %v5426_v55 }
0x11f0   :  { %5427 = vrcp.f32 %v1905_v57 }
0x11fa   :  { %v5428_v59 = vpop.eup %5427 }
0x11fb   :  { %v1919_v2 = vsub.f32 1.0, %v5428_v59  ;;  %v1925_v6 = vmul.f32 %v5428_v59, %v6073_v51  ;;  %v2017_v51 = vld [vmem:[%s2016_s25] sm:$0x1] }
0x1251   :  { %v1910_v60 = vpop.permute.xlu1 %1909 }
0x1252   :  { %v1912_v61 = vmul.f32 %v5428_v59, %v1910_v60 }
0x1254   :  { %1914 = vrot.lane.b32.xlu0 %v1912_v61, %s5575_s5 }
0x12c6   :  { %v1915_v62 = vpop.permute.xlu0 %1914 }
0x12c7   :  { %v1917_v63 = vadd.f32 %v1915_v62, %v1828_v50 }
0x12c9   :  { %5429 = vtanh.f32 %v1917_v63 }
0x12d3   :  { %v5430_v1 = vpop.eup %5429 }
0x12d4   :  { %1921 = vrot.lane.b32.xlu1 %v5430_v1, %s5577_s1 }
0x1346   :  { %v1922_v5 = vpop.permute.xlu1 %1921 }
0x1347   :  { %v1924_v14 = vmul.f32 %v1922_v5, %v1919_v2 }
0x1349   :  { %v6164_v15 = vadd.f32 %v1925_v6, %v1924_v14 }
0x134b   :  { %1928 = vrot.lane.b32.xlu1 %v6164_v15, %s5577_s1 }
0x13bd   :  { %v6168_v17 = vpop.permute.xlu1 %1928 }
0x13be   :  { %4657 = vmatmul.mubr.msk.f32.vlgmr.msra.gmra.mrb[20].mxu0 %vm113_vm1, %v6168_v17  ;;  %4668 = vmatmul.mubr.msk.f32.vlgmr.msra.gmra.mrb[26].mxu1 %vm113_vm1, %v6168_v17 }
0x13bf   :  { %5201 = vmatpush3.bf16.msra.mxu0 %v5710_v8  ;;  %4678 = vmatprep.mubr.msk.f32.mxu0 %vm5573_vm0, %v5574_v11 }
0x13c0   :  { %5202 = vmatprep.subr.bf16.mxu0 %v5572_v3  ;;  %5207 = vmatpush3.bf16.msra.mxu1 %v5768_v27 }
0x13c1   :  { %5208 = vmatprep.subr.bf16.mxu1 %v5572_v3  ;;  %4713 = vmatprep.mubr.msk.f32.mxu1 %vm5573_vm0, %v5574_v11 }
0x13c3   :  { %5204 = vmatpush3.bf16.msra.mxu0 %v5727_v13 }
0x13c4   :  { %5210 = vmatpush3.bf16.msra.mxu1 %v5774_v29  ;;  %5229 = vmatprep.subr.bf16.mxu0 %v5572_v3 }
0x13c5   :  { %5211 = vmatprep.subr.bf16.mxu1 %v5572_v3 }
0x13c6   :  { %4679 = vmatmul.mubr.msk.f32.vlgmr.msra.gmra.mrb[22].mxu0 %vm113_vm1, %v2017_v51 }
0x13c7   :  { %5231 = vmatpush3.bf16.msra.mxu0 %v5849_v56  ;;  %4724 = vmatprep.mubr.msk.f32.mxu0 %vm5573_vm0, %v5574_v11 }
0x13c8   :  { %5213 = vmatpush3.bf16.msra.mxu1 %v5784_v32  ;;  %5232 = vmatprep.subr.bf16.mxu0 %v5572_v3 }
0x13c9   :  { %5214 = vmatprep.subr.bf16.mxu1 %v5572_v3 }
0x13cb   :  { %5234 = vmatpush3.bf16.msra.mxu0 %v5855_v58 }
0x13cc   :  { %5216 = vmatpush3.bf16.msra.mxu1 %v5794_v35  ;;  %5235 = vmatprep.subr.bf16.mxu0 %v5572_v3 }
0x13cd   :  { %5217 = vmatprep.subr.bf16.mxu1 %v5572_v3 }
0x13d0   :  { %5219 = vmatpush3.bf16.msra.mxu1 %v5804_v38 }
0x13d1   :  { %5220 = vmatprep.subr.bf16.mxu1 %v5572_v3 }
0x13d4   :  { %5222 = vmatpush3.bf16.msra.mxu1 %v5816_v46 }
0x13d5   :  { %5223 = vmatprep.subr.bf16.mxu1 %v5572_v3 }
0x13d8   :  { %5225 = vmatpush3.bf16.msra.mxu1 %v5825_v49 }
0x13d9   :  { %5226 = vmatprep.subr.bf16.mxu1 %v5572_v3 }
0x13dc   :  { %5228 = vmatpush3.bf16.msra.mxu1 %v5835_v52 }
0x13dd   :  { %5253 = vmatprep.subr.bf16.mxu1 %v5572_v3 }
0x1491   :  { %v6208_v20 = vpop.f32.mrb[20].mxu0  ;;  %v2084_v21 = vpop.f32.mrb[26].mxu1 }
0x1492   :  { %v4658_v23 = vpop.f32.mrb[21].mxu0  ;;  %v4669_v24 = vpop.f32.mrb[27].mxu1 }
0x1499   :  { %v2157_v26 = vpop.f32.mrb[22].mxu0 }
0x149a   :  { %v2158_v28 = vadd.f32 %v2157_v26, %v2084_v21  ;;  %v4680_v33 = vpop.f32.mrb[23].mxu0 }
0x149c   :  { %v2161_v34 = vadd.f32 %v2158_v28, %v5755_v19 }
0x149e   :  { %v2162_v36 = vsel %vm261_vm2, %v2161_v34, -inf }
0x149f   :  { %2163 = vmax.xlane.f32.xlu0 %v2162_v36 }
0x152c   :  { %v2164_v39 = vpop.xlane.xlu0 %2163 }
0x152d   :  { %v2165_v40 = vsub.f32 %v2161_v34, %v2164_v39 }
0x152f   :  { %v2166_v42 = vmul.f32 1.442695, %v2165_v40 }
0x1531   :  { %5431 = vpow2.f32 %v2166_v42 }
0x153b   :  { %v5432_v43 = vpop.eup %5431 }
0x153c   :  { %v2168_v44 = vsel %vm261_vm2, %v5432_v43, 0.0 }
0x153d   :  { %2169 = vadd.xlane.f32.xlu1 %v2168_v44 }
0x15ca   :  { %v2170_v47 = vpop.xlane.xlu1 %2169 }
0x15cb   :  { %5433 = vrcp.f32 %v2170_v47 }
0x15d5   :  { %v5434_v48 = vpop.eup %5433 }
0x15d6   :  { %v2172_v50 = vmul.f32 %v5434_v48, %v5432_v43 }
0x15d8   :  { %2173 = vst [vmem:[#allocation8 + $0x3] sm:$0x1] %v2172_v50  ;;  %4714 = vmatmul.mubr.f32.vlgmr.msra.gmra.mrb[28].mxu1 %v2172_v50 }
0x15d9   :  { %5255 = vmatpush3.bf16.msra.mxu1 %v5970_v9  ;;  %4768 = vmatprep.mubr.msk.f32.mxu1 %vm5573_vm0, %v5574_v11 }
0x15da   :  { %5256 = vmatprep.subr.bf16.mxu1 %v5572_v3 }
0x15dd   :  { %5258 = vmatpush3.bf16.msra.mxu1 %v5976_v10 }
0x15de   :  { %5265 = vmatprep.subr.bf16.mxu1 %v5572_v3 }
0x16ab   :  { %v2240_v19 = vpop.f32.mrb[28].mxu1 }
0x16ac   :  { %v4715_v53 = vpop.f32.mrb[29].mxu1  ;;  %4725 = vmatmul.mubr.msk.f32.vlgmr.msra.gmra.mrb[24].mxu0 %vm113_vm1, %v2240_v19 }
0x16ad   :  { %5237 = vmatpush3.bf16.msra.mxu0 %v5868_v0  ;;  %4735 = vmatprep.mubr.msk.f32.mxu0 %vm5573_vm0, %v5574_v11 }
0x16ae   :  { %5238 = vmatprep.subr.bf16.mxu0 %v5572_v3 }
0x16b1   :  { %5240 = vmatpush3.bf16.msra.mxu0 %v5878_v7 }
0x16b2   :  { %5241 = vmatprep.subr.bf16.mxu0 %v5572_v3 }
0x16b4   :  { %4736 = vmatmul.mubr.msk.f32.vlgmr.msra.gmra.mrb[26].mxu0 %vm113_vm1, %v2017_v51 }
0x16b5   :  { %5243 = vmatpush3.bf16.msra.mxu0 %v5895_v16  ;;  %4746 = vmatprep.mubr.msk.f32.mxu0 %vm5573_vm0, %v5574_v11 }
0x16b6   :  { %5244 = vmatprep.subr.bf16.mxu0 %v5572_v3 }
0x16b9   :  { %5246 = vmatpush3.bf16.msra.mxu0 %v5905_v18 }
0x16ba   :  { %5247 = vmatprep.subr.bf16.mxu0 %v5572_v3 }
0x177f   :  { %v2313_v25 = vpop.f32.mrb[24].mxu0 }
0x1780   :  { %v4726_v55 = vpop.f32.mrb[25].mxu0 }
0x1781   :  { %v6304_v55 = vld [vmem:[%s6518_s6] sm:$0x1] }
0x1787   :  { %v2383_v57 = vpop.f32.mrb[26].mxu0 }
0x1788   :  { %v2384_v59 = vadd.f32 %v2383_v57, %v2313_v25  ;;  %v4737_v60 = vpop.f32.mrb[27].mxu0 }
0x178a   :  { %v2387_v61 = vadd.f32 %v2384_v59, %v5912_v22 }
0x178c   :  { %v2388_v62 = vmax.f32 %v2387_v61, 0.0 }
0x178e   :  { %4747 = vmatmul.mubr.msk.f32.vlgmr.msra.gmra.mrb[28].mxu0 %vm113_vm1, %v2388_v62 }
0x178f   :  { %5249 = vmatpush3.bf16.msra.mxu0 %v5921_v31  ;;  %4757 = vmatprep.mubr.msk.f32.mxu0 %vm5573_vm0, %v5574_v11 }
0x1790   :  { %5250 = vmatprep.subr.bf16.mxu0 %v5572_v3 }
0x1793   :  { %5252 = vmatpush3.bf16.msra.mxu0 %v5931_v37 }
0x1794   :  { %5259 = vmatprep.subr.bf16.mxu0 %v5572_v3 }
0x1796   :  { %4758 = vmatmul.mubr.msk.f32.vlgmr.msra.gmra.mrb[30].mxu0 %vm113_vm1, %v6168_v17 }
0x1797   :  { %5261 = vmatpush3.bf16.msra.mxu0 %v5699_v4  ;;  %4779 = vmatprep.mubr.msk.f32.mxu0 %vm5573_vm0, %v5574_v11 }
0x1798   :  { %5262 = vmatprep.subr.bf16.mxu0 %v5572_v3 }
0x179b   :  { %5264 = vmatpush3.bf16.msra.mxu0 %v5723_v12 }
0x179c   :  { %5271 = vmatprep.subr.bf16.mxu0 %v5572_v3 }
0x1861   :  { %v2458_v22 = vpop.f32.mrb[28].mxu0 }
0x1862   :  { %v4748_v63 = vpop.f32.mrb[29].mxu0  ;;  %v2459_v6 = vadd.f32 %v2458_v22, %v5956_v45 }
0x1869   :  { %v2528_v1 = vpop.f32.mrb[30].mxu0 }
0x186a   :  { %v2529_v2 = vadd.f32 %v2528_v1, %v5949_v41  ;;  %v4759_v5 = vpop.f32.mrb[31].mxu0 }
0x186c   :  { %2540 = vrot.lane.b32.xlu0 %v2529_v2, %s5575_s5  ;;  %v2532_v14 = vadd.f32 %v2529_v2, %v2459_v6 }
0x186e   :  { %v3991_v17 = vmul.f32 -1.442695, %v2532_v14 }
0x1870   :  { %5435 = vpow2.f32 %v3991_v17 }
0x187a   :  { %v5436_v51 = vpop.eup %5435 }
0x187b   :  { %v2536_v21 = vadd.f32 1.0, %v5436_v51 }
0x187d   :  { %5437 = vrcp.f32 %v2536_v21 }
0x1887   :  { %v5438_v23 = vpop.eup %5437 }
0x1888   :  { %v2550_v34 = vsub.f32 1.0, %v5438_v23  ;;  %v2556_v39 = vmul.f32 %v5438_v23, %v6164_v15  ;;  %v2648_v15 = vld [vmem:[%s2647_s29] sm:$0x1] }
0x18de   :  { %v2541_v24 = vpop.permute.xlu0 %2540 }
0x18df   :  { %v2543_v26 = vmul.f32 %v5438_v23, %v2541_v24 }
0x18e1   :  { %2545 = vrot.lane.b32.xlu1 %v2543_v26, %s5575_s5  ;;  %v6332_v26 = vld [vmem:[%s6521_s9] sm:$0x1] }
0x1953   :  { %v2546_v28 = vpop.permute.xlu1 %2545 }
0x1954   :  { %v2548_v33 = vadd.f32 %v2546_v28, %v2459_v6 }
0x1956   :  { %5439 = vtanh.f32 %v2548_v33 }
0x1960   :  { %v5440_v41 = vpop.eup %5439 }
0x1961   :  { %2552 = vrot.lane.b32.xlu0 %v5440_v41, %s5577_s1 }
0x19d3   :  { %v2553_v36 = vpop.permute.xlu0 %2552 }
0x19d4   :  { %v2555_v40 = vmul.f32 %v2553_v36, %v2550_v34 }
0x19d6   :  { %v6255_v42 = vadd.f32 %v2556_v39, %v2555_v40  ;;  %v6353_v39 = vld [vmem:[%s6525_s13] sm:$0x1]  ;;  %s4002_s13 = sld [smem:[#allocation3 + $0x5]] }
0x19d8   :  { %2559 = vrot.lane.b32.xlu1 %v6255_v42, %s5577_s1 }
0x19dc   :  { %s3278_s8 = scalar_lea.vmem %s6540_s11, %s4002_s13 }
0x1a4a   :  { %v6259_v43 = vpop.permute.xlu1 %2559 }
0x1a4b   :  { %4769 = vmatmul.mubr.msk.f32.vlgmr.msra.gmra.mrb[30].mxu1 %vm113_vm1, %v6259_v43  ;;  %4780 = vmatmul.mubr.msk.f32.vlgmr.msra.gmra.mrb[32].mxu0 %vm113_vm1, %v6259_v43 }
0x1a4c   :  { %5267 = vmatpush3.bf16.msra.mxu1 %v5710_v8  ;;  %4790 = vmatprep.mubr.msk.f32.mxu1 %vm5573_vm0, %v5574_v11 }
0x1a4d   :  { %5268 = vmatprep.subr.bf16.mxu1 %v5572_v3  ;;  %5273 = vmatpush3.bf16.msra.mxu0 %v5768_v27 }
0x1a4e   :  { %5274 = vmatprep.subr.bf16.mxu0 %v5572_v3  ;;  %4825 = vmatprep.mubr.msk.f32.mxu0 %vm5573_vm0, %v5574_v11 }
0x1a50   :  { %5270 = vmatpush3.bf16.msra.mxu1 %v5727_v13 }
0x1a51   :  { %5276 = vmatpush3.bf16.msra.mxu0 %v5774_v29  ;;  %5295 = vmatprep.subr.bf16.mxu1 %v5572_v3 }
0x1a52   :  { %5277 = vmatprep.subr.bf16.mxu0 %v5572_v3 }
0x1a53   :  { %4791 = vmatmul.mubr.msk.f32.vlgmr.msra.gmra.mrb[32].mxu1 %vm113_vm1, %v2648_v15 }
0x1a54   :  { %5297 = vmatpush3.bf16.msra.mxu1 %v5849_v56  ;;  %4836 = vmatprep.mubr.msk.f32.mxu1 %vm5573_vm0, %v5574_v11 }
0x1a55   :  { %5279 = vmatpush3.bf16.msra.mxu0 %v5784_v32  ;;  %5298 = vmatprep.subr.bf16.mxu1 %v5572_v3 }
0x1a56   :  { %5280 = vmatprep.subr.bf16.mxu0 %v5572_v3 }
0x1a58   :  { %5300 = vmatpush3.bf16.msra.mxu1 %v5855_v58 }
0x1a59   :  { %5282 = vmatpush3.bf16.msra.mxu0 %v5794_v35  ;;  %5301 = vmatprep.subr.bf16.mxu1 %v5572_v3 }
0x1a5a   :  { %5283 = vmatprep.subr.bf16.mxu0 %v5572_v3 }
0x1a5d   :  { %5285 = vmatpush3.bf16.msra.mxu0 %v5804_v38 }
0x1a5e   :  { %5286 = vmatprep.subr.bf16.mxu0 %v5572_v3 }
0x1a61   :  { %5288 = vmatpush3.bf16.msra.mxu0 %v5816_v46 }
0x1a62   :  { %5289 = vmatprep.subr.bf16.mxu0 %v5572_v3 }
0x1a65   :  { %5291 = vmatpush3.bf16.msra.mxu0 %v5825_v49 }
0x1a66   :  { %5292 = vmatprep.subr.bf16.mxu0 %v5572_v3 }
0x1a69   :  { %5294 = vmatpush3.bf16.msra.mxu0 %v5835_v52 }
0x1a6a   :  { %5319 = vmatprep.subr.bf16.mxu0 %v5572_v3 }
0x1b1e   :  { %v6299_v44 = vpop.f32.mrb[30].mxu1  ;;  %v2715_v47 = vpop.f32.mrb[32].mxu0 }
0x1b1f   :  { %v4770_v48 = vpop.f32.mrb[31].mxu1  ;;  %v4781_v50 = vpop.f32.mrb[33].mxu0 }
0x1b26   :  { %v2788_v19 = vpop.f32.mrb[32].mxu1 }
0x1b27   :  { %v2789_v53 = vadd.f32 %v2788_v19, %v2715_v47  ;;  %v4792_v25 = vpop.f32.mrb[33].mxu1 }
0x1b29   :  { %v2792_v57 = vadd.f32 %v6304_v55, %v2789_v53 }
0x1b2b   :  { %v2793_v59 = vsel %vm261_vm2, %v2792_v57, -inf }
0x1b2c   :  { %2794 = vmax.xlane.f32.xlu0 %v2793_v59 }
0x1bb9   :  { %v2795_v60 = vpop.xlane.xlu0 %2794 }
0x1bba   :  { %v2796_v61 = vsub.f32 %v2792_v57, %v2795_v60 }
0x1bbc   :  { %v2797_v62 = vmul.f32 1.442695, %v2796_v61 }
0x1bbe   :  { %5441 = vpow2.f32 %v2797_v62 }
0x1bc8   :  { %v5442_v22 = vpop.eup %5441 }
0x1bc9   :  { %v2799_v63 = vsel %vm261_vm2, %v5442_v22, 0.0 }
0x1bca   :  { %2800 = vadd.xlane.f32.xlu1 %v2799_v63 }
0x1c57   :  { %v2801_v1 = vpop.xlane.xlu1 %2800 }
0x1c58   :  { %5443 = vrcp.f32 %v2801_v1 }
0x1c62   :  { %v5444_v2 = vpop.eup %5443 }
0x1c63   :  { %v2803_v5 = vmul.f32 %v5444_v2, %v5442_v22 }
0x1c65   :  { %2804 = vst [vmem:[#allocation8 + $0x4] sm:$0x1] %v2803_v5  ;;  %4826 = vmatmul.mubr.f32.vlgmr.msra.gmra.mrb[34].mxu0 %v2803_v5 }
0x1c66   :  { %5321 = vmatpush3.bf16.msra.mxu0 %v5970_v9  ;;  %4880 = vmatprep.mubr.msk.f32.mxu0 %vm5573_vm0, %v5574_v11 }
0x1c67   :  { %5322 = vmatprep.subr.bf16.mxu0 %v5572_v3 }
0x1c6a   :  { %5324 = vmatpush3.bf16.msra.mxu0 %v5976_v10 }
0x1c6b   :  { %5331 = vmatprep.subr.bf16.mxu0 %v5572_v3 }
0x1d38   :  { %v2871_v6 = vpop.f32.mrb[34].mxu0 }
0x1d39   :  { %v4827_v14 = vpop.f32.mrb[35].mxu0  ;;  %4837 = vmatmul.mubr.msk.f32.vlgmr.msra.gmra.mrb[34].mxu1 %vm113_vm1, %v2871_v6 }
0x1d3a   :  { %5303 = vmatpush3.bf16.msra.mxu1 %v5868_v0  ;;  %4847 = vmatprep.mubr.msk.f32.mxu1 %vm5573_vm0, %v5574_v11 }
0x1d3b   :  { %5304 = vmatprep.subr.bf16.mxu1 %v5572_v3 }
0x1d3e   :  { %5306 = vmatpush3.bf16.msra.mxu1 %v5878_v7 }
0x1d3f   :  { %5307 = vmatprep.subr.bf16.mxu1 %v5572_v3 }
0x1d41   :  { %4848 = vmatmul.mubr.msk.f32.vlgmr.msra.gmra.mrb[36].mxu1 %vm113_vm1, %v2648_v15 }
0x1d42   :  { %5309 = vmatpush3.bf16.msra.mxu1 %v5895_v16  ;;  %4858 = vmatprep.mubr.msk.f32.mxu1 %vm5573_vm0, %v5574_v11 }
0x1d43   :  { %5310 = vmatprep.subr.bf16.mxu1 %v5572_v3 }
0x1d46   :  { %5312 = vmatpush3.bf16.msra.mxu1 %v5905_v18 }
0x1d47   :  { %5313 = vmatprep.subr.bf16.mxu1 %v5572_v3 }
0x1e0c   :  { %v2944_v17 = vpop.f32.mrb[34].mxu1 }
0x1e0d   :  { %v4838_v51 = vpop.f32.mrb[35].mxu1 }
0x1e14   :  { %v3014_v21 = vpop.f32.mrb[36].mxu1 }
0x1e15   :  { %v3015_v23 = vadd.f32 %v3014_v21, %v2944_v17  ;;  %v4849_v24 = vpop.f32.mrb[37].mxu1 }
0x1e17   :  { %v3018_v28 = vadd.f32 %v6332_v26, %v3015_v23 }
0x1e19   :  { %v3019_v33 = vmax.f32 %v3018_v28, 0.0 }
0x1e1b   :  { %4859 = vmatmul.mubr.msk.f32.vlgmr.msra.gmra.mrb[38].mxu1 %vm113_vm1, %v3019_v33 }
0x1e1c   :  { %5315 = vmatpush3.bf16.msra.mxu1 %v5921_v31  ;;  %4869 = vmatprep.mubr.msk.f32.mxu1 %vm5573_vm0, %v5574_v11 }
0x1e1d   :  { %5316 = vmatprep.subr.bf16.mxu1 %v5572_v3 }
0x1e20   :  { %5318 = vmatpush3.bf16.msra.mxu1 %v5931_v37 }
0x1e21   :  { %5325 = vmatprep.subr.bf16.mxu1 %v5572_v3 }
0x1e23   :  { %4870 = vmatmul.mubr.msk.f32.vlgmr.msra.gmra.mrb[40].mxu1 %vm113_vm1, %v6259_v43 }
0x1e24   :  { %5327 = vmatpush3.bf16.msra.mxu1 %v5699_v4  ;;  %4891 = vmatprep.mubr.msk.f32.mxu1 %vm5573_vm0, %v5574_v11 }
0x1e25   :  { %5328 = vmatprep.subr.bf16.mxu1 %v5572_v3 }
0x1e28   :  { %5330 = vmatpush3.bf16.msra.mxu1 %v5723_v12 }
0x1e29   :  { %5337 = vmatprep.subr.bf16.mxu1 %v5572_v3 }
0x1eee   :  { %v3089_v41 = vpop.f32.mrb[38].mxu1 }
0x1eef   :  { %v4860_v34 = vpop.f32.mrb[39].mxu1  ;;  %v3090_v43 = vadd.f32 %v3089_v41, %v5956_v45 }
0x1ef6   :  { %v3159_v36 = vpop.f32.mrb[40].mxu1 }
0x1ef7   :  { %v3160_v40 = vadd.f32 %v6353_v39, %v3159_v36  ;;  %v4871_v4 = vpop.f32.mrb[41].mxu1 }
0x1ef9   :  { %3171 = vrot.lane.b32.xlu0 %v3160_v40, %s5575_s5  ;;  %v3163_v15 = vadd.f32 %v3160_v40, %v3090_v43 }
0x1efb   :  { %v4000_v47 = vmul.f32 -1.442695, %v3163_v15  ;;  %v6448_v15 = vld [vmem:[%s6527_s15] sm:$0x1]  ;;  %s5578_s15 = smov [#allocation6]  }
0x1efd   :  { %5445 = vpow2.f32 %v4000_v47  ;;  %v737_v47 = vadd.f32 %v6026_v30, %v6448_v15 }
0x1f07   :  { %v5446_v12 = vpop.eup %5445 }
0x1f08   :  { %v3167_v48 = vadd.f32 1.0, %v5446_v12  ;;  %v1999_v12 = vadd.f32 %v6208_v20, %v6448_v15  ;;  %v1368_v20 = vadd.f32 %v6117_v54, %v6448_v15 }
0x1f0a   :  { %5447 = vrcp.f32 %v3167_v48  ;;  %v740_v48 = vsel %vm261_vm2, %v737_v47, -inf }
0x1f14   :  { %v5448_v50 = vpop.eup %5447 }
0x1f15   :  { %v3181_v60 = vsub.f32 1.0, %v5448_v50  ;;  %v3187_v45 = vmul.f32 %v5448_v50, %v6255_v42  ;;  %v3279_v42 = vld [vmem:[%s3278_s8] sm:$0x1] }
0x1f6b   :  { %v3172_v19 = vpop.permute.xlu0 %3171 }
0x1f6c   :  { %v3174_v53 = vmul.f32 %v5448_v50, %v3172_v19  ;;  %v2630_v50 = vadd.f32 %v6299_v44, %v6448_v15  ;;  %v2002_v19 = vsel %vm261_vm2, %v1999_v12, -inf }
0x1f6e   :  { %3176 = vrot.lane.b32.xlu1 %v3174_v53, %s5575_s5  ;;  %v2633_v53 = vsel %vm261_vm2, %v2630_v50, -inf }
0x1fe0   :  { %v3177_v25 = vpop.permute.xlu1 %3176 }
0x1fe1   :  { %v3179_v57 = vadd.f32 %v3177_v25, %v3090_v43 }
0x1fe3   :  { %5449 = vtanh.f32 %v3179_v57 }
0x1fed   :  { %v5450_v59 = vpop.eup %5449 }
0x1fee   :  { %3183 = vrot.lane.b32.xlu0 %v5450_v59, %s5577_s1 }
0x2060   :  { %v3184_v61 = vpop.permute.xlu0 %3183 }
0x2061   :  { %v3186_v62 = vmul.f32 %v3184_v61, %v3181_v60  ;;  %v1371_v61 = vsel %vm261_vm2, %v1368_v20, -inf }
0x2063   :  { %v6361_v22 = vadd.f32 %v3187_v45, %v3186_v62 }
0x2065   :  { %3190 = vrot.lane.b32.xlu1 %v6361_v22, %s5577_s1 }
0x20d7   :  { %v6365_v63 = vpop.permute.xlu1 %3190 }
0x20d8   :  { %4881 = vmatmul.mubr.msk.f32.vlgmr.msra.gmra.mrb[36].mxu0 %vm113_vm1, %v6365_v63  ;;  %4892 = vmatmul.mubr.msk.f32.vlgmr.msra.gmra.mrb[42].mxu1 %vm113_vm1, %v6365_v63 }
0x20d9   :  { %5333 = vmatpush3.bf16.msra.mxu0 %v5710_v8  ;;  %4902 = vmatprep.mubr.msk.f32.mxu0 %vm5573_vm0, %v5574_v11 }
0x20da   :  { %5334 = vmatprep.subr.bf16.mxu0 %v5572_v3  ;;  %5339 = vmatpush3.bf16.msra.mxu1 %v5768_v27 }
0x20db   :  { %5340 = vmatprep.subr.bf16.mxu1 %v5572_v3  ;;  %4937 = vmatprep.mubr.msk.f32.mxu1 %vm5573_vm0, %v5574_v11 }
0x20dd   :  { %5336 = vmatpush3.bf16.msra.mxu0 %v5727_v13 }
0x20de   :  { %5342 = vmatpush3.bf16.msra.mxu1 %v5774_v29  ;;  %5361 = vmatprep.subr.bf16.mxu0 %v5572_v3 }
0x20df   :  { %5343 = vmatprep.subr.bf16.mxu1 %v5572_v3 }
0x20e0   :  { %4903 = vmatmul.mubr.msk.f32.vlgmr.msra.gmra.mrb[38].mxu0 %vm113_vm1, %v3279_v42 }
0x20e1   :  { %5363 = vmatpush3.bf16.msra.mxu0 %v5849_v56  ;;  %4948 = vmatprep.mubr.msk.f32.mxu0 %vm5573_vm0, %v5574_v11 }
0x20e2   :  { %5345 = vmatpush3.bf16.msra.mxu1 %v5784_v32  ;;  %5364 = vmatprep.subr.bf16.mxu0 %v5572_v3 }
0x20e3   :  { %5346 = vmatprep.subr.bf16.mxu1 %v5572_v3 }
0x20e5   :  { %5366 = vmatpush3.bf16.msra.mxu0 %v5855_v58 }
0x20e6   :  { %5348 = vmatpush3.bf16.msra.mxu1 %v5794_v35  ;;  %5367 = vmatprep.subr.bf16.mxu0 %v5572_v3 }
0x20e7   :  { %5349 = vmatprep.subr.bf16.mxu1 %v5572_v3 }
0x20ea   :  { %5351 = vmatpush3.bf16.msra.mxu1 %v5804_v38 }
0x20eb   :  { %5352 = vmatprep.subr.bf16.mxu1 %v5572_v3 }
0x20ee   :  { %5354 = vmatpush3.bf16.msra.mxu1 %v5816_v46 }
0x20ef   :  { %5355 = vmatprep.subr.bf16.mxu1 %v5572_v3 }
0x20f2   :  { %5357 = vmatpush3.bf16.msra.mxu1 %v5825_v49 }
0x20f3   :  { %5358 = vmatprep.subr.bf16.mxu1 %v5572_v3 }
0x20f6   :  { %5360 = vmatpush3.bf16.msra.mxu1 %v5835_v52 }
0x20f7   :  { %5385 = vmatprep.subr.bf16.mxu1 %v5572_v3 }
0x21ab   :  { %v6405_v8 = vpop.f32.mrb[36].mxu0  ;;  %v3346_v13 = vpop.f32.mrb[42].mxu1 }
0x21ac   :  { %v4882_v27 = vpop.f32.mrb[37].mxu0  ;;  %v4893_v29 = vpop.f32.mrb[43].mxu1  ;;  %v3261_v44 = vadd.f32 %v6405_v8, %v6448_v15 }
0x21ae   :  { %v3264_v45 = vsel %vm261_vm2, %v3261_v44, -inf }
0x21b3   :  { %v3419_v32 = vpop.f32.mrb[38].mxu0 }
0x21b4   :  { %v3420_v35 = vadd.f32 %v3419_v32, %v3346_v13  ;;  %v4904_v38 = vpop.f32.mrb[39].mxu0 }
0x21b6   :  { %v3423_v46 = vadd.f32 %v6304_v55, %v3420_v35 }
0x21b8   :  { %v3424_v56 = vsel %vm261_vm2, %v3423_v46, -inf }
0x21b9   :  { %3425 = vmax.xlane.f32.xlu0 %v3424_v56 }
0x2246   :  { %v3426_v49 = vpop.xlane.xlu0 %3425 }
0x2247   :  { %v3427_v58 = vsub.f32 %v3423_v46, %v3426_v49 }
0x2249   :  { %v3428_v1 = vmul.f32 1.442695, %v3427_v58 }
0x224b   :  { %5451 = vpow2.f32 %v3428_v1 }
0x2255   :  { %v5452_v52 = vpop.eup %5451 }
0x2256   :  { %v3430_v2 = vsel %vm261_vm2, %v5452_v52, 0.0 }
0x2257   :  { %3431 = vadd.xlane.f32.xlu1 %v3430_v2 }
0x22e4   :  { %v3432_v5 = vpop.xlane.xlu1 %3431 }
0x22e5   :  { %5453 = vrcp.f32 %v3432_v5 }
0x22ef   :  { %v5454_v6 = vpop.eup %5453 }
0x22f0   :  { %v3434_v14 = vmul.f32 %v5454_v6, %v5452_v52 }
0x22f2   :  { %3435 = vst [vmem:[#allocation8 + $0x5] sm:$0x1] %v3434_v14  ;;  %4938 = vmatmul.mubr.f32.vlgmr.msra.gmra.mrb[44].mxu1 %v3434_v14 }
0x22f3   :  { %5387 = vmatpush3.bf16.msra.mxu1 %v5970_v9  ;;  %4992 = vmatprep.mubr.msk.f32.mxu1 %vm5573_vm0, %v5574_v11 }
0x22f4   :  { %5388 = vmatprep.subr.bf16.mxu1 %v5572_v3 }
0x22f7   :  { %5390 = vmatpush3.bf16.msra.mxu1 %v5976_v10 }
0x23c5   :  { %v3502_v55 = vpop.f32.mrb[44].mxu1 }
0x23c6   :  { %v4939_v17 = vpop.f32.mrb[45].mxu1  ;;  %4949 = vmatmul.mubr.msk.f32.vlgmr.msra.gmra.mrb[40].mxu0 %vm113_vm1, %v3502_v55 }
0x23c7   :  { %5369 = vmatpush3.bf16.msra.mxu0 %v5868_v0  ;;  %4959 = vmatprep.mubr.msk.f32.mxu0 %vm5573_vm0, %v5574_v11 }
0x23c8   :  { %5370 = vmatprep.subr.bf16.mxu0 %v5572_v3 }
0x23cb   :  { %5372 = vmatpush3.bf16.msra.mxu0 %v5878_v7 }
0x23cc   :  { %5373 = vmatprep.subr.bf16.mxu0 %v5572_v3 }
0x23ce   :  { %4960 = vmatmul.mubr.msk.f32.vlgmr.msra.gmra.mrb[42].mxu0 %vm113_vm1, %v3279_v42 }
0x23cf   :  { %5375 = vmatpush3.bf16.msra.mxu0 %v5895_v16  ;;  %4970 = vmatprep.mubr.msk.f32.mxu0 %vm5573_vm0, %v5574_v11 }
0x23d0   :  { %5376 = vmatprep.subr.bf16.mxu0 %v5572_v3 }
0x23d3   :  { %5378 = vmatpush3.bf16.msra.mxu0 %v5905_v18 }
0x23d4   :  { %5379 = vmatprep.subr.bf16.mxu0 %v5572_v3 }
0x2499   :  { %v3575_v0 = vpop.f32.mrb[40].mxu0 }
0x249a   :  { %v4950_v9 = vpop.f32.mrb[41].mxu0 }
0x24a1   :  { %v3645_v10 = vpop.f32.mrb[42].mxu0 }
0x24a2   :  { %v3646_v51 = vadd.f32 %v3645_v10, %v3575_v0  ;;  %v4961_v7 = vpop.f32.mrb[43].mxu0 }
0x24a4   :  { %v3649_v21 = vadd.f32 %v6332_v26, %v3646_v51 }
0x24a6   :  { %v3650_v23 = vmax.f32 %v3649_v21, 0.0 }
0x24a8   :  { %4971 = vmatmul.mubr.msk.f32.vlgmr.msra.gmra.mrb[44].mxu0 %vm113_vm1, %v3650_v23 }
0x24a9   :  { %5381 = vmatpush3.bf16.msra.mxu0 %v5921_v31  ;;  %4981 = vmatprep.mubr.msk.f32.mxu0 %vm5573_vm0, %v5574_v11  ;;  %v5488_v31 = vld [vmem:[%s6541_s24] sm:$0x1] }
0x24aa   :  { %5382 = vmatprep.subr.bf16.mxu0 %v5572_v3 }
0x24ad   :  { %5384 = vmatpush3.bf16.msra.mxu0 %v5931_v37 }
0x24b0   :  { %4982 = vmatmul.mubr.msk.f32.vlgmr.msra.gmra.mrb[46].mxu0 %vm113_vm1, %v6365_v63 }
0x257b   :  { %v3720_v16 = vpop.f32.mrb[44].mxu0 }
0x257c   :  { %v4972_v18 = vpop.f32.mrb[45].mxu0  ;;  %v3721_v11 = vadd.f32 %v5488_v31, %v3720_v16 }
0x2583   :  { %v3790_v24 = vpop.f32.mrb[46].mxu0 }
0x2584   :  { %v3791_v26 = vadd.f32 %v6353_v39, %v3790_v24  ;;  %v4983_v28 = vpop.f32.mrb[47].mxu0 }
0x2586   :  { %3802 = vrot.lane.b32.xlu0 %v3791_v26, %s5575_s5  ;;  %v3794_v33 = vadd.f32 %v3791_v26, %v3721_v11 }
0x2588   :  { %v4009_v3 = vmul.f32 -1.442695, %v3794_v33 }
0x258a   :  { %5455 = vpow2.f32 %v4009_v3 }
0x2594   :  { %v5456_v37 = vpop.eup %5455 }
0x2595   :  { %v3798_v41 = vadd.f32 1.0, %v5456_v37 }
0x2597   :  { %5457 = vrcp.f32 %v3798_v41 }
0x25a1   :  { %v5458_v34 = vpop.eup %5457 }
0x25a2   :  { %v3812_v25 = vsub.f32 1.0, %v5458_v34  ;;  %v3818_v59 = vmul.f32 %v5458_v34, %v6361_v22 }
0x25f8   :  { %v3803_v36 = vpop.permute.xlu0 %3802 }
0x25f9   :  { %v3805_v40 = vmul.f32 %v5458_v34, %v3803_v36 }
0x25fb   :  { %3807 = vrot.lane.b32.xlu1 %v3805_v40, %s5575_s5  ;;  %s3927_s5 = sshll.u32 %s5578_s15, 4  ;;  %s3928_s5 = int_to_ptr.vmem [resolvable:$true] %s3927_s5 }
0x25fc   :  { %s5503_s22 = scalar_lea.vmem %s3928_s5, 32  ;;  %p5504_p4 = scmp.lt.s32.totalorder %s3928_s5, %s3928_s5 }
0x266d   :  { %v3808_v39 = vpop.permute.xlu1 %3807 }
0x266e   :  { %v3810_v4 = vadd.f32 %v3808_v39, %v3721_v11 }
0x2670   :  { %5459 = vtanh.f32 %v3810_v4 }
0x267a   :  { %v5460_v43 = vpop.eup %5459 }
0x267b   :  { %3814 = vrot.lane.b32.xlu0 %v5460_v43, %s5577_s1 }
0x269a   :  { %741 = vmax.xlane.f32.xlu0 %v740_v48 }
0x269e   :  { %2003 = vmax.xlane.f32.xlu0 %v2002_v19 }
0x26a2   :  { %2634 = vmax.xlane.f32.xlu0 %v2633_v53 }
0x26ed   :  { %v3815_v57 = vpop.permute.xlu0 %3814 }
0x26ee   :  { %v3817_v30 = vmul.f32 %v3815_v57, %v3812_v25 }
0x26f0   :  { %v3819_v60 = vadd.f32 %v3818_v59, %v3817_v30 }
0x26f2   :  { %3821 = vrot.lane.b32.xlu1 %v3819_v60, %s5577_s1  ;;  %s5499_s1 = scalar_lea.vmem %s3928_s5, 16 }
0x26f3   :  { %p5500_p3 = scmp.ne.s32.totalorder %s3928_s5, %s5499_s1  ;;  %p5505_p5 = scmp.lt.s32.totalorder %s5503_s22, %s5499_s1 }
0x26f5   :  { %p5506_p6 = por %p5505_p5, %p5504_p4 }
0x26f7   :  { %p5507_p7 = pnand %p5506_p6, %p5500_p3 }
0x2716   :  { %1372 = vmax.xlane.f32.xlu1 %v1371_v61 }
0x271a   :  { %3265 = vmax.xlane.f32.xlu1 %v3264_v45 }
0x2727   :  { %v742_v62 = vpop.xlane.xlu0 %741 }
0x2728   :  { %v743_v63 = vsub.f32 %v737_v47, %v742_v62 }
0x272a   :  { %v744_v42 = vmul.f32 1.442695, %v743_v63 }
0x272b   :  { %v2004_v22 = vpop.xlane.xlu0 %2003 }
0x272c   :  { %5461 = vpow2.f32 %v744_v42  ;;  %v2005_v13 = vsub.f32 %v1999_v12, %v2004_v22 }
0x272e   :  { %v2006_v27 = vmul.f32 1.442695, %v2005_v13 }
0x272f   :  { %v2635_v10 = vpop.xlane.xlu0 %2634 }
0x2730   :  { %5463 = vpow2.f32 %v2006_v27  ;;  %v2636_v51 = vsub.f32 %v2630_v50, %v2635_v10 }
0x2732   :  { %v2637_v21 = vmul.f32 1.442695, %v2636_v51 }
0x2736   :  { %v5462_v29 = vpop.eup %5461 }
0x2737   :  { %v746_v54 = vsel %vm261_vm2, %v5462_v29, 0.0 }
0x2738   :  { %747 = vadd.xlane.f32.xlu1 %v746_v54 }
0x273a   :  { %v5464_v32 = vpop.eup %5463 }
0x273b   :  { %v2008_v8 = vsel %vm261_vm2, %v5464_v32, 0.0 }
0x273c   :  { %2009 = vadd.xlane.f32.xlu1 %v2008_v8 }
0x2764   :  { %v3822_v35 = vpop.permute.xlu1 %3821 }
0x2765   :  { %4993 = vmatmul.mubr.msk.f32.vlgmr.msra.gmra.mrb[46].mxu1 %vm113_vm1, %v3822_v35  ;;  %3910 = vst.msk [vmem:[#allocation6] sm:$0x1] %vm3909_vm3, %v3822_v35 }
0x27a3   :  { %v1373_v38 = vpop.xlane.xlu1 %1372 }
0x27a4   :  { %v1374_v9 = vsub.f32 %v1368_v20, %v1373_v38 }
0x27a6   :  { %v1375_v7 = vmul.f32 1.442695, %v1374_v9 }
0x27a7   :  { %v3266_v46 = vpop.xlane.xlu1 %3265 }
0x27a8   :  { %v3267_v56 = vsub.f32 %v3261_v44, %v3266_v46 }
0x27aa   :  { %v3268_v49 = vmul.f32 1.442695, %v3267_v56 }
0x27ac   :  { %5465 = vpow2.f32 %v3268_v49 }
0x27b6   :  { %v5466_v58 = vpop.eup %5465 }
0x27b7   :  { %v3270_v1 = vsel %vm261_vm2, %v5466_v58, 0.0 }
0x27b8   :  { %3271 = vadd.xlane.f32.xlu1 %v3270_v1 }
0x27c5   :  { %v748_v52 = vpop.xlane.xlu1 %747 }
0x27c6   :  { %5467 = vlog2.f32 %v748_v52 }
0x27c9   :  { %v2010_v2 = vpop.xlane.xlu1 %2009 }
0x27ca   :  { %5469 = vlog2.f32 %v2010_v2 }
0x27cb   :  { %5471 = vpow2.f32 %v1375_v7 }
0x27cc   :  { %5473 = vpow2.f32 %v2637_v21 }
0x27d0   :  { %v5468_v5 = vpop.eup %5467 }
0x27d1   :  { %v750_v6 = vmul.f32 0.6931472, %v5468_v5 }
0x27d3   :  { %v751_v14 = vsub.f32 %v743_v63, %v750_v6 }
0x27d4   :  { %v5470_v55 = vpop.eup %5469 }
0x27d5   :  { %752 = vst [vmem:[#allocation4] sm:$0x1] %v751_v14  ;;  %v2012_v17 = vmul.f32 0.6931472, %v5470_v55  ;;  %v5472_v26 = vpop.eup %5471 }
0x27d6   :  { %v1377_v28 = vsel %vm261_vm2, %v5472_v26, 0.0  ;;  %v5474_v31 = vpop.eup %5473 }
0x27d7   :  { %v2013_v0 = vsub.f32 %v2005_v13, %v2012_v17  ;;  %v2639_v11 = vsel %vm261_vm2, %v5474_v31, 0.0 }
0x27d9   :  { %2014 = vst [vmem:[#allocation4 + $0x2] sm:$0x1] %v2013_v0 }
0x2838   :  { %v3891_v23 = vpop.f32.mrb[46].mxu1 }
0x2839   :  { %v3892_v16 = vadd.f32 %v3891_v23, %v6448_v15  ;;  %v4994_v18 = vpop.f32.mrb[47].mxu1 }
0x283b   :  { %v3895_v24 = vsel %vm261_vm2, %v3892_v16, -inf }
0x283c   :  { %3896 = vmax.xlane.f32.xlu0 %v3895_v24 }
0x2840   :  { %1378 = vadd.xlane.f32.xlu0 %v1377_v28 }
0x2844   :  { %2640 = vadd.xlane.f32.xlu0 %v2639_v11 }
0x2845   :  { %v3272_v33 = vpop.xlane.xlu1 %3271 }
0x2846   :  { %5475 = vlog2.f32 %v3272_v33 }
0x2850   :  { %v5476_v3 = vpop.eup %5475 }
0x2851   :  { %v3274_v37 = vmul.f32 0.6931472, %v5476_v3 }
0x2853   :  { %v3275_v41 = vsub.f32 %v3267_v56, %v3274_v37 }
0x2855   :  { %3276 = vst [vmem:[#allocation4 + $0x4] sm:$0x1] %v3275_v41 }
0x28c9   :  { %v3897_v34 = vpop.xlane.xlu0 %3896 }
0x28ca   :  { %v3898_v36 = vsub.f32 %v3892_v16, %v3897_v34 }
0x28cc   :  { %v3899_v40 = vmul.f32 1.442695, %v3898_v36 }
0x28cd   :  { %v1379_v39 = vpop.xlane.xlu0 %1378 }
0x28ce   :  { %5477 = vpow2.f32 %v3899_v40 }
0x28cf   :  { %5479 = vlog2.f32 %v1379_v39 }
0x28d1   :  { %v2641_v4 = vpop.xlane.xlu0 %2640 }
0x28d2   :  { %5481 = vlog2.f32 %v2641_v4 }
0x28d8   :  { %v5478_v43 = vpop.eup %5477 }
0x28d9   :  { %v5480_v15 = vpop.eup %5479  ;;  %v3901_v47 = vsel %vm261_vm2, %v5478_v43, 0.0 }
0x28da   :  { %v1381_v12 = vmul.f32 0.6931472, %v5480_v15  ;;  %3902 = vadd.xlane.f32.xlu0 %v3901_v47 }
0x28dc   :  { %v5482_v48 = vpop.eup %5481  ;;  %v1382_v50 = vsub.f32 %v1374_v9, %v1381_v12 }
0x28dd   :  { %v2643_v19 = vmul.f32 0.6931472, %v5482_v48 }
0x28de   :  { %1383 = vst [vmem:[#allocation4 + $0x1] sm:$0x1] %v1382_v50 }
0x28df   :  { %v2644_v53 = vsub.f32 %v2636_v51, %v2643_v19 }
0x28e1   :  { %2645 = vst [vmem:[#allocation4 + $0x3] sm:$0x1] %v2644_v53 }
0x28e2   :  { %5510 = shalt.err (!%p5507_p7)
}
0x28e3   :  { %s5511_s4 = scalar_lea.hbm %s6529_s17, 16 }
0x28e4   :  { %p5512_p8 = scmp.ne.s32.totalorder %s6529_s17, %s5511_s4  ;;  %p5515_p9 = scmp.lt.u32.totalorder %s5511_s4, %s6529_s17 }
0x28e6   :  { %p5517_p10 = pnand %p5515_p9, %p5512_p8 }
0x28e8   :  { %5520 = shalt.err (!%p5517_p10)
}
0x28e9   :  { %3930 = dma.vmem_to_hbm [thread:$0]  %s3928_s5, 16, %s6529_s17, [#allocation7]  }
0x28ea   :  { %s5579_s29 = smov [#allocation8]  }
0x28eb   :  { %s3937_s30 = sshll.u32 %s5579_s29, 4  ;;  %s3938_s30 = int_to_ptr.vmem [resolvable:$true] %s3937_s30 }
0x28ec   :  { %s5521_s0 = scalar_lea.vmem %s3938_s30, 128  ;;  %p5526_p12 = scmp.lt.s32.totalorder %s3938_s30, %s3938_s30 }
0x28ed   :  { %p5522_p11 = scmp.ne.s32.totalorder %s3938_s30, %s5521_s0  ;;  %p5527_p13 = scmp.lt.s32.totalorder %s5521_s0, %s5521_s0 }
0x28ef   :  { %p5528_p0 = por %p5527_p13, %p5526_p12 }
0x28f1   :  { %p5529_p1 = pnand %p5528_p0, %p5522_p11 }
0x28f3   :  { %5532 = shalt.err (!%p5529_p1)
}
0x28f4   :  { %s5533_s9 = scalar_lea.hbm %s6530_s18, 128 }
0x28f5   :  { %p5534_p2 = scmp.ne.s32.totalorder %s6530_s18, %s5533_s9  ;;  %p5537_p3 = scmp.lt.u32.totalorder %s5533_s9, %s6530_s18 }
0x28f7   :  { %p5539_p4 = pnand %p5537_p3, %p5534_p2 }
0x28f9   :  { %5542 = shalt.err (!%p5539_p4)
}
0x28fa   :  { %3940 = dma.vmem_to_hbm [thread:$0]  %s3938_s30, 128, %s6530_s18, [#allocation7]  }
0x28fb   :  { %s5580_s11 = smov [#allocation4]  }
0x28fc   :  { %s3917_s20 = sshll.u32 %s5580_s11, 4  ;;  %s3918_s20 = int_to_ptr.vmem [resolvable:$true] %s3917_s20 }
0x28fd   :  { %s5543_s21 = scalar_lea.vmem %s3918_s20, 128  ;;  %p5548_p6 = scmp.lt.s32.totalorder %s3918_s20, %s3918_s20 }
0x28fe   :  { %p5544_p5 = scmp.ne.s32.totalorder %s3918_s20, %s5543_s21  ;;  %p5549_p7 = scmp.lt.s32.totalorder %s5543_s21, %s5543_s21 }
0x2900   :  { %p5550_p8 = por %p5549_p7, %p5548_p6 }
0x2902   :  { %p5551_p9 = pnand %p5550_p8, %p5544_p5 }
0x2967   :  { %v3903_v25 = vpop.xlane.xlu0 %3902 }
0x2968   :  { %5483 = vlog2.f32 %v3903_v25 }
0x2972   :  { %v5484_v57 = vpop.eup %5483 }
0x2973   :  { %v3905_v59 = vmul.f32 0.6931472, %v5484_v57 }
0x2975   :  { %v3906_v30 = vsub.f32 %v3898_v36, %v3905_v59 }
0x2977   :  { %3907 = vst [vmem:[#allocation4 + $0x5] sm:$0x1] %v3906_v30 }
0x2978   :  { %5554 = shalt.err (!%p5551_p9)
}
0x2979   :  { %s5555_s18 = scalar_lea.hbm %s6528_s16, 128 }
0x297a   :  { %p5556_p10 = scmp.ne.s32.totalorder %s6528_s16, %s5555_s18  ;;  %p5559_p11 = scmp.lt.u32.totalorder %s5555_s18, %s6528_s16 }
0x297c   :  { %p5561_p12 = pnand %p5559_p11, %p5556_p10 }
0x297e   :  { %5564 = shalt.err (!%p5561_p12)
}
0x297f   :  { %3920 = dma.vmem_to_hbm [thread:$0]  %s3918_s20, 128, %s6528_s16, [#allocation5]  }
0x2980   :  { %5567 = dma.done.wait [#allocation5], 128  }
0x2981   :  { %5568 = vsyncadd [#allocation5], 4294967168 }
0x2982   :  { %5569 = dma.done.wait [#allocation7], 144  }
0x2983   :  { %5570 = vsyncadd [#allocation7], 4294967152 }
0x2984   :  { %3950 = vsyncpa [#allocation5], 1 }
0x2985   :  { %3951 = vsyncpa [#allocation7], 1 }

</bundles_post_ra>
